<compile_context>
chip_gen: v6e
topology: v6e:2x2x1
jax: 0.10.0
libtpu: 0.0.40
codegen_flags: <defaults>
</compile_context>

<pallas_src>
import jax
import jax.numpy as jnp
from jax.experimental import pallas as pl
from jax.experimental.pallas import tpu as pltpu

BN_EPS = 1e-5
LANE = 128


def _round_up(n, m=LANE):
    return ((n + m - 1) // m) * m


def _vmem_spec():
    # Whole-array block resident in VMEM (every operand here is tiny).
    return pl.BlockSpec(memory_space=pltpu.MemorySpace.VMEM)


# --------------------------- fused SiameseArm kernel --------------------------
def siamese_arm_kernel(
    x_ref,                                        # (B, C, P)  f32 (NCHW, HW flattened)
    wcT_ref, bcT_ref,                             # (Dp, C) f32, (Dp, 1) f32
    pw1_ref, pg_ref, pb_ref, pw2_ref, pb2_ref,    # projector params
    qw1_ref, qg_ref, qb_ref, qw2_ref, qb2_ref,    # predictor params
    y_ref, z_ref, h_ref,                          # (B, Dp), (B, Op), (B, Op) f32
):
    B, C, P = x_ref.shape

    wcT = wcT_ref[...]                            # (Dp, C) f32
    bcT = bcT_ref[...]                            # (Dp, 1) f32
    ones_row = jnp.ones((1, P), jnp.bfloat16)     # pooling vector (exact in bf16)
    inv_p = 1.0 / P
    dn = (((1,), (1,)), ((), ()))                 # contract lane dims: A . B^T

    # ----- encoder: 1x1 conv as C broadcast-FMAs on the VPU (f32, spatial lane-dense),
    #       ReLU, then global-average-pool as an MXU matmul that directly produces the
    #       (1, Dp) row for sample b (no reshape, no transpose, feat streamed once).
    #       Two bf16 pool passes (hi + lo residual) keep ~f32 accuracy on the MXU.
    rows = []
    for b in range(B):                            # B=2: static unroll
        xb = x_ref[b]                             # (C, P) f32
        acc = bcT + wcT[:, 0:1] * xb[0:1, :]      # (Dp, P) outer-product FMA
        for c in range(1, C):
            acc = acc + wcT[:, c:c + 1] * xb[c:c + 1, :]
        fb = jnp.maximum(acc, 0.0)                # (Dp, P) f32
        hi = fb.astype(jnp.bfloat16)
        lo = (fb - hi.astype(jnp.float32)).astype(jnp.bfloat16)
        s = (jax.lax.dot_general(ones_row, hi, dn, preferred_element_type=jnp.float32)
             + jax.lax.dot_general(ones_row, lo, dn, preferred_element_type=jnp.float32))
        rows.append(s * inv_p)                    # (1, Dp) f32
    y = jnp.concatenate(rows, axis=0)             # (B, Dp) f32
    y_ref[...] = y

    # ----- MLP: Linear(no bias) -> BatchNorm1d(train, biased var) -> ReLU -> Linear -
    #       matmuls in bf16 with f32 accumulation; BN / ReLU / bias math stays in f32.
    def mlp(x_f32, w1_ref, g_ref, b_ref, w2_ref, b2_ref):
        h1 = jnp.dot(x_f32.astype(jnp.bfloat16), w1_ref[...],
                     preferred_element_type=jnp.float32)          # (B, Hp) f32
        mean = jnp.mean(h1, axis=0, keepdims=True)                # batch stats
        var = jnp.mean((h1 - mean) ** 2, axis=0, keepdims=True)   # biased variance
        hn = (h1 - mean) * jax.lax.rsqrt(var + BN_EPS) * g_ref[...] + b_ref[...]
        hr = jnp.maximum(hn, 0.0)
        return jnp.dot(hr.astype(jnp.bfloat16), w2_ref[...],
                       preferred_element_type=jnp.float32) + b2_ref[...]

    z = mlp(y, pw1_ref, pg_ref, pb_ref, pw2_ref, pb2_ref)
    z_ref[...] = z
    h_ref[...] = mlp(z, qw1_ref, qg_ref, qb_ref, qw2_ref, qb2_ref)


# --------------------------- wrapper / parameter prep -------------------------
def pad_kernel_params(params):
    """Pad feature dims to lane multiples of 128, pre-transpose the conv weight,
    cast MXU matmul weights to bf16.  Runs once, off the forward hot path."""
    def pad_cols(a, n):
        return jnp.pad(a, [(0, 0)] * (a.ndim - 1) + [(0, n - a.shape[-1])])

    def pad_mat(a, r, c):
        return jnp.pad(a, ((0, r - a.shape[0]), (0, c - a.shape[1])))

    wc = params["enc"]["wc"]                      # (C, input_dim)
    C = wc.shape[0]
    Dp = _round_up(wc.shape[1])
    Hp = _round_up(params["proj"]["w1"].shape[1])
    Op = _round_up(params["proj"]["w2"].shape[1])

    # Encoder params stored transposed: output channels on sublanes so the in-kernel
    # conv and pool are lane-dense over the spatial dim.  Stays f32 (VPU math).
    enc = dict(
        wcT=pad_mat(wc.T, Dp, C),                          # (Dp, C)
        bcT=pad_mat(params["enc"]["bc"].T, Dp, 1),         # (Dp, 1)
    )

    # K dims are padded only to the padded width of the activation they contract
    # with (keeps zero lanes zero end-to-end); at real SimSiam widths every dim is
    # already a multiple of 128, so no padding overhead occurs there.
    def mlp(p, din_p, dout_p):
        return dict(
            w1=pad_mat(p["w1"], din_p, Hp).astype(jnp.bfloat16),
            gamma=pad_cols(p["gamma"], Hp),
            beta=pad_cols(p["beta"], Hp),
            w2=pad_mat(p["w2"], Hp, dout_p).astype(jnp.bfloat16),
            b2=pad_cols(p["b2"], dout_p),
        )

    return dict(enc=enc,
                proj=mlp(params["proj"], Dp, Op),
                pred=mlp(params["pred"], Op, Op))


def siamese_arm_forward(x_nchw, kparams):
    """Fused SiameseArm forward.  Returns (y, z, h) at padded lane width (multiples
    of 128); padded lanes are exactly zero, so the SimSiam loss can consume them
    unchanged -- no post-kernel slicing HLOs on the hot path."""
    B, C, H, W = x_nchw.shape
    P = H * W
    x3 = x_nchw.reshape(B, C, P)      # free: NCHW is already (B, C, H*W)-contiguous

    enc, proj, pred = kparams["enc"], kparams["proj"], kparams["pred"]
    Dp = enc["wcT"].shape[0]
    Hp = proj["w1"].shape[1]
    Op = proj["w2"].shape[1]

    operands = (x3, enc["wcT"], enc["bcT"],
                proj["w1"], proj["gamma"], proj["beta"], proj["w2"], proj["b2"],
                pred["w1"], pred["gamma"], pred["beta"], pred["w2"], pred["b2"])

    flops = (2 * B * C * Dp * P                    # 1x1 conv FMAs
             + 2 * 2 * B * Dp * P                  # two-pass pooling matmul
             + 2 * B * (Dp * Hp + Hp * Op)         # projector matmuls
             + 2 * B * (Op * Hp + Hp * Op))        # predictor matmuls
    bytes_accessed = (sum(int(a.size) * a.dtype.itemsize for a in operands)
                      + 4 * (B * Dp + 2 * B * Op))

    y_p, z_p, h_p = pl.pallas_call(
        siamese_arm_kernel,
        out_shape=(
            jax.ShapeDtypeStruct((B, Dp), jnp.float32),
            jax.ShapeDtypeStruct((B, Op), jnp.float32),
            jax.ShapeDtypeStruct((B, Op), jnp.float32),
        ),
        in_specs=[_vmem_spec()] * len(operands),
        out_specs=(_vmem_spec(), _vmem_spec(), _vmem_spec()),
        compiler_params=pltpu.CompilerParams(vmem_limit_bytes=32 * 1024 * 1024),
        cost_estimate=pl.CostEstimate(flops=flops, transcendentals=2 * Hp,
                                      bytes_accessed=bytes_accessed),
    )(*operands)
    return y_p, z_p, h_p


# ------------------------- deterministic parameters ---------------------------
def init_params(key, C, input_dim, hidden_size, output_dim):
    ks = jax.random.split(key, 8)

    def lin(k, fan_in, fan_out):
        bound = fan_in ** -0.5
        return jax.random.uniform(k, (fan_in, fan_out), jnp.float32, -bound, bound)

    enc = dict(
        wc=lin(ks[0], C, input_dim),
        bc=jax.random.uniform(ks[1], (1, input_dim), jnp.float32, -0.5, 0.5),
    )

    def mlp(k1, k2, k3, din, dout):
        return dict(
            w1=lin(k1, din, hidden_size),
            gamma=jnp.ones((1, hidden_size), jnp.float32),   # BN init: weight=1
            beta=jnp.zeros((1, hidden_size), jnp.float32),   # BN init: bias=0
            w2=lin(k2, hidden_size, dout),
            b2=jax.random.uniform(k3, (1, dout), jnp.float32,
                                  -(hidden_size ** -0.5), hidden_size ** -0.5),
        )

    proj = mlp(ks[2], ks[3], ks[4], input_dim, output_dim)
    pred = mlp(ks[5], ks[6], ks[7], output_dim, output_dim)
    return dict(enc=enc, proj=proj, pred=pred)


# --------------------------------- reference ----------------------------------
def _ref_mlp(x, p):
    h1 = jnp.dot(x.astype(jnp.bfloat16), p["w1"].astype(jnp.bfloat16),
                 preferred_element_type=jnp.float32)
    mean = jnp.mean(h1, axis=0, keepdims=True)
    var = jnp.mean((h1 - mean) ** 2, axis=0, keepdims=True)
    hn = (h1 - mean) * jax.lax.rsqrt(var + BN_EPS) * p["gamma"] + p["beta"]
    return jnp.dot(jnp.maximum(hn, 0.0).astype(jnp.bfloat16),
                   p["w2"].astype(jnp.bfloat16),
                   preferred_element_type=jnp.float32) + p["b2"]


def _ref_forward(x, params):
    B, C, H, W = x.shape
    x3 = x.reshape(B, C, H * W)
    feat = jnp.einsum("bcp,cd->bpd", x3, params["enc"]["wc"],
                      precision=jax.lax.Precision.HIGHEST) + params["enc"]["bc"]
    feat = jnp.maximum(feat, 0.0)
    y = jnp.mean(feat, axis=1)
    z = _ref_mlp(y, params["proj"])
    h = _ref_mlp(z, params["pred"])
    return y, z, h


# ----------------------------------- main --------------------------------------
if __name__ == "__main__":
    B, C, H, W = 2, 4, 16, 16            # x: NCHW, like PyTorch
    input_dim, hidden_size, output_dim = 32, 64, 16

    key = jax.random.PRNGKey(0)
    kx, kp = jax.random.split(key)
    x = jax.random.normal(kx, (B, C, H, W), jnp.float32)

    params = init_params(kp, C, input_dim, hidden_size, output_dim)   # logical (f32)
    kparams = pad_kernel_params(params)                               # padded / bf16

    fwd = jax.jit(siamese_arm_forward)
    y_p, z_p, h_p = jax.block_until_ready(fwd(x, kparams))

    # Padded lanes are exactly zero by construction -> the SimSiam loss could consume
    # the padded outputs directly; slice back to logical widths only for the check.
    assert bool(jnp.all(y_p[:, input_dim:] == 0.0))
    assert bool(jnp.all(z_p[:, output_dim:] == 0.0))
    assert bool(jnp.all(h_p[:, output_dim:] == 0.0))

    y = y_p[:, :input_dim]
    z = z_p[:, :output_dim]
    h = h_p[:, :output_dim]
    assert y.shape == (B, input_dim)
    assert z.shape == (B, output_dim)
    assert h.shape == (B, output_dim)

    y_r, z_r, h_r = _ref_forward(x, params)
    # y: full-f32 VPU conv + ~f32 two-pass MXU pool -> tight match.
    # z/h: bf16 MXU matmuls feeding training-mode BatchNorm over B=2 (rsqrt of a tiny
    # biased batch variance) amplify rounding-order differences -> looser tolerances.
    assert jnp.allclose(y, y_r, atol=1e-4, rtol=1e-4)
    assert jnp.allclose(z, z_r, atol=2e-2, rtol=2e-2)
    assert jnp.allclose(h, h_r, atol=3e-2, rtol=3e-2)

    print("KERNEL_OK")
</pallas_src>

<mosaic_0001>
module attributes {stable_mosaic.version = 11 : i64} {
  func.func @siamese_arm_kernel(%arg0: memref<2x4x256xf32, #tpu.memory_space<vmem>>, %arg1: memref<128x4xf32, #tpu.memory_space<vmem>>, %arg2: memref<128x1xf32, #tpu.memory_space<vmem>>, %arg3: memref<128x128xbf16, #tpu.memory_space<vmem>>, %arg4: memref<1x128xf32, #tpu.memory_space<vmem>>, %arg5: memref<1x128xf32, #tpu.memory_space<vmem>>, %arg6: memref<128x128xbf16, #tpu.memory_space<vmem>>, %arg7: memref<1x128xf32, #tpu.memory_space<vmem>>, %arg8: memref<128x128xbf16, #tpu.memory_space<vmem>>, %arg9: memref<1x128xf32, #tpu.memory_space<vmem>>, %arg10: memref<1x128xf32, #tpu.memory_space<vmem>>, %arg11: memref<128x128xbf16, #tpu.memory_space<vmem>>, %arg12: memref<1x128xf32, #tpu.memory_space<vmem>>, %arg13: memref<2x128xf32, #tpu.memory_space<vmem>>, %arg14: memref<2x128xf32, #tpu.memory_space<vmem>>, %arg15: memref<2x128xf32, #tpu.memory_space<vmem>>) attributes {dimension_semantics = [], scalar_prefetch = 0 : i64, scratch_operands = 0 : i64, tpu.core_type = #tpu.core_type<tc>} {
    %c0 = arith.constant 0 : index
    %c0_0 = arith.constant 0 : index
    %0 = vector.load %arg1[%c0, %c0_0] : memref<128x4xf32, #tpu.memory_space<vmem>>, vector<128x4xf32>
    %c0_1 = arith.constant 0 : index
    %c0_2 = arith.constant 0 : index
    %1 = vector.load %arg2[%c0_1, %c0_2] : memref<128x1xf32, #tpu.memory_space<vmem>>, vector<128x1xf32>
    %cst = arith.constant 1.000000e+00 : bf16
    %2 = vector.broadcast %cst : bf16 to vector<1x256xbf16>
    %c0_3 = arith.constant 0 : index
    %c0_4 = arith.constant 0 : index
    %c0_5 = arith.constant 0 : index
    %3 = vector.load %arg0[%c0_3, %c0_4, %c0_5] : memref<2x4x256xf32, #tpu.memory_space<vmem>>, vector<1x4x256xf32>
    %4 = vector.shape_cast %3 : vector<1x4x256xf32> to vector<4x256xf32>
    %5 = vector.extract_strided_slice %0 {offsets = [0, 0], sizes = [128, 1], strides = [1, 1]} : vector<128x4xf32> to vector<128x1xf32>
    %6 = vector.extract_strided_slice %4 {offsets = [0, 0], sizes = [1, 256], strides = [1, 1]} : vector<4x256xf32> to vector<1x256xf32>
    %7 = vector.broadcast %5 : vector<128x1xf32> to vector<128x256xf32>
    %8 = vector.broadcast %6 : vector<1x256xf32> to vector<128x256xf32>
    %9 = arith.mulf %7, %8 : vector<128x256xf32>
    %10 = vector.broadcast %1 : vector<128x1xf32> to vector<128x256xf32>
    %11 = arith.addf %10, %9 : vector<128x256xf32>
    %12 = vector.extract_strided_slice %0 {offsets = [0, 1], sizes = [128, 1], strides = [1, 1]} : vector<128x4xf32> to vector<128x1xf32>
    %13 = vector.extract_strided_slice %4 {offsets = [1, 0], sizes = [1, 256], strides = [1, 1]} : vector<4x256xf32> to vector<1x256xf32>
    %14 = vector.broadcast %12 : vector<128x1xf32> to vector<128x256xf32>
    %15 = vector.broadcast %13 : vector<1x256xf32> to vector<128x256xf32>
    %16 = arith.mulf %14, %15 : vector<128x256xf32>
    %17 = arith.addf %11, %16 : vector<128x256xf32>
    %18 = vector.extract_strided_slice %0 {offsets = [0, 2], sizes = [128, 1], strides = [1, 1]} : vector<128x4xf32> to vector<128x1xf32>
    %19 = vector.extract_strided_slice %4 {offsets = [2, 0], sizes = [1, 256], strides = [1, 1]} : vector<4x256xf32> to vector<1x256xf32>
    %20 = vector.broadcast %18 : vector<128x1xf32> to vector<128x256xf32>
    %21 = vector.broadcast %19 : vector<1x256xf32> to vector<128x256xf32>
    %22 = arith.mulf %20, %21 : vector<128x256xf32>
    %23 = arith.addf %17, %22 : vector<128x256xf32>
    %24 = vector.extract_strided_slice %0 {offsets = [0, 3], sizes = [128, 1], strides = [1, 1]} : vector<128x4xf32> to vector<128x1xf32>
    %25 = vector.extract_strided_slice %4 {offsets = [3, 0], sizes = [1, 256], strides = [1, 1]} : vector<4x256xf32> to vector<1x256xf32>
    %26 = vector.broadcast %24 : vector<128x1xf32> to vector<128x256xf32>
    %27 = vector.broadcast %25 : vector<1x256xf32> to vector<128x256xf32>
    %28 = arith.mulf %26, %27 : vector<128x256xf32>
    %29 = arith.addf %23, %28 : vector<128x256xf32>
    %cst_6 = arith.constant 0.000000e+00 : f32
    %30 = vector.broadcast %cst_6 : f32 to vector<128x256xf32>
    %31 = arith.maximumf %29, %30 : vector<128x256xf32>
    %32 = arith.truncf %31 : vector<128x256xf32> to vector<128x256xbf16>
    %33 = arith.extf %32 : vector<128x256xbf16> to vector<128x256xf32>
    %34 = arith.subf %31, %33 : vector<128x256xf32>
    %35 = arith.truncf %34 : vector<128x256xf32> to vector<128x256xbf16>
    %cst_7 = arith.constant dense<0.000000e+00> : vector<1x128xf32>
    %36 = tpu.matmul %2, %32, %cst_7 {dimension_numbers = #tpu.dot_dimension_numbers<[1], [1], [0], [0], [0, 0, 1, 0], [], []>} : vector<1x256xbf16>, vector<128x256xbf16>, vector<1x128xf32> -> vector<1x128xf32>
    %cst_8 = arith.constant dense<0.000000e+00> : vector<1x128xf32>
    %37 = tpu.matmul %2, %35, %cst_8 {dimension_numbers = #tpu.dot_dimension_numbers<[1], [1], [0], [0], [0, 0, 1, 0], [], []>} : vector<1x256xbf16>, vector<128x256xbf16>, vector<1x128xf32> -> vector<1x128xf32>
    %38 = arith.addf %36, %37 : vector<1x128xf32>
    %cst_9 = arith.constant 3.906250e-03 : f32
    %39 = vector.broadcast %cst_9 : f32 to vector<1x128xf32>
    %40 = arith.mulf %38, %39 : vector<1x128xf32>
    %c1 = arith.constant 1 : index
    %c0_10 = arith.constant 0 : index
    %c0_11 = arith.constant 0 : index
    %41 = vector.load %arg0[%c1, %c0_10, %c0_11] : memref<2x4x256xf32, #tpu.memory_space<vmem>>, vector<1x4x256xf32>
    %42 = vector.shape_cast %41 : vector<1x4x256xf32> to vector<4x256xf32>
    %43 = vector.extract_strided_slice %0 {offsets = [0, 0], sizes = [128, 1], strides = [1, 1]} : vector<128x4xf32> to vector<128x1xf32>
    %44 = vector.extract_strided_slice %42 {offsets = [0, 0], sizes = [1, 256], strides = [1, 1]} : vector<4x256xf32> to vector<1x256xf32>
    %45 = vector.broadcast %43 : vector<128x1xf32> to vector<128x256xf32>
    %46 = vector.broadcast %44 : vector<1x256xf32> to vector<128x256xf32>
    %47 = arith.mulf %45, %46 : vector<128x256xf32>
    %48 = vector.broadcast %1 : vector<128x1xf32> to vector<128x256xf32>
    %49 = arith.addf %48, %47 : vector<128x256xf32>
    %50 = vector.extract_strided_slice %0 {offsets = [0, 1], sizes = [128, 1], strides = [1, 1]} : vector<128x4xf32> to vector<128x1xf32>
    %51 = vector.extract_strided_slice %42 {offsets = [1, 0], sizes = [1, 256], strides = [1, 1]} : vector<4x256xf32> to vector<1x256xf32>
    %52 = vector.broadcast %50 : vector<128x1xf32> to vector<128x256xf32>
    %53 = vector.broadcast %51 : vector<1x256xf32> to vector<128x256xf32>
    %54 = arith.mulf %52, %53 : vector<128x256xf32>
    %55 = arith.addf %49, %54 : vector<128x256xf32>
    %56 = vector.extract_strided_slice %0 {offsets = [0, 2], sizes = [128, 1], strides = [1, 1]} : vector<128x4xf32> to vector<128x1xf32>
    %57 = vector.extract_strided_slice %42 {offsets = [2, 0], sizes = [1, 256], strides = [1, 1]} : vector<4x256xf32> to vector<1x256xf32>
    %58 = vector.broadcast %56 : vector<128x1xf32> to vector<128x256xf32>
    %59 = vector.broadcast %57 : vector<1x256xf32> to vector<128x256xf32>
    %60 = arith.mulf %58, %59 : vector<128x256xf32>
    %61 = arith.addf %55, %60 : vector<128x256xf32>
    %62 = vector.extract_strided_slice %0 {offsets = [0, 3], sizes = [128, 1], strides = [1, 1]} : vector<128x4xf32> to vector<128x1xf32>
    %63 = vector.extract_strided_slice %42 {offsets = [3, 0], sizes = [1, 256], strides = [1, 1]} : vector<4x256xf32> to vector<1x256xf32>
    %64 = vector.broadcast %62 : vector<128x1xf32> to vector<128x256xf32>
    %65 = vector.broadcast %63 : vector<1x256xf32> to vector<128x256xf32>
    %66 = arith.mulf %64, %65 : vector<128x256xf32>
    %67 = arith.addf %61, %66 : vector<128x256xf32>
    %cst_12 = arith.constant 0.000000e+00 : f32
    %68 = vector.broadcast %cst_12 : f32 to vector<128x256xf32>
    %69 = arith.maximumf %67, %68 : vector<128x256xf32>
    %70 = arith.truncf %69 : vector<128x256xf32> to vector<128x256xbf16>
    %71 = arith.extf %70 : vector<128x256xbf16> to vector<128x256xf32>
    %72 = arith.subf %69, %71 : vector<128x256xf32>
    %73 = arith.truncf %72 : vector<128x256xf32> to vector<128x256xbf16>
    %cst_13 = arith.constant dense<0.000000e+00> : vector<1x128xf32>
    %74 = tpu.matmul %2, %70, %cst_13 {dimension_numbers = #tpu.dot_dimension_numbers<[1], [1], [0], [0], [0, 0, 1, 0], [], []>} : vector<1x256xbf16>, vector<128x256xbf16>, vector<1x128xf32> -> vector<1x128xf32>
    %cst_14 = arith.constant dense<0.000000e+00> : vector<1x128xf32>
    %75 = tpu.matmul %2, %73, %cst_14 {dimension_numbers = #tpu.dot_dimension_numbers<[1], [1], [0], [0], [0, 0, 1, 0], [], []>} : vector<1x256xbf16>, vector<128x256xbf16>, vector<1x128xf32> -> vector<1x128xf32>
    %76 = arith.addf %74, %75 : vector<1x128xf32>
    %cst_15 = arith.constant 3.906250e-03 : f32
    %77 = vector.broadcast %cst_15 : f32 to vector<1x128xf32>
    %78 = arith.mulf %76, %77 : vector<1x128xf32>
    %79 = tpu.concatenate %40, %78 in 0 : vector<1x128xf32>, vector<1x128xf32> -> vector<2x128xf32>
    %c0_16 = arith.constant 0 : index
    %c0_17 = arith.constant 0 : index
    %80 = vector.load %arg13[%c0_16, %c0_17] : memref<2x128xf32, #tpu.memory_space<vmem>>, vector<2x128xf32>
    tpu.vector_store %arg13[%c0_16, %c0_17], %79 {strides = array<i32>} : memref<2x128xf32, #tpu.memory_space<vmem>>, vector<2x128xf32>,
    %81 = arith.truncf %79 : vector<2x128xf32> to vector<2x128xbf16>
    %c0_18 = arith.constant 0 : index
    %c0_19 = arith.constant 0 : index
    %82 = vector.load %arg3[%c0_18, %c0_19] : memref<128x128xbf16, #tpu.memory_space<vmem>>, vector<128x128xbf16>
    %cst_20 = arith.constant dense<0.000000e+00> : vector<2x128xf32>
    %83 = tpu.matmul %81, %82, %cst_20 {dimension_numbers = #tpu.dot_dimension_numbers<[1], [0], [0], [1], [0, 0, 1, 1], [], []>} : vector<2x128xbf16>, vector<128x128xbf16>, vector<2x128xf32> -> vector<2x128xf32>
    %cst_21 = arith.constant dense<0.000000e+00> : vector<128xf32>
    %84 = vector.multi_reduction <add>, %83, %cst_21 [0] : vector<2x128xf32> to vector<128xf32>
    %85 = vector.shape_cast %84 : vector<128xf32> to vector<1x128xf32>
    %cst_22 = arith.constant 2.000000e+00 : f32
    %86 = vector.broadcast %cst_22 : f32 to vector<1x128xf32>
    %87 = arith.divf %85, %86 : vector<1x128xf32>
    %88 = vector.broadcast %87 : vector<1x128xf32> to vector<2x128xf32>
    %89 = arith.subf %83, %88 : vector<2x128xf32>
    %90 = arith.mulf %89, %89 : vector<2x128xf32>
    %cst_23 = arith.constant dense<0.000000e+00> : vector<128xf32>
    %91 = vector.multi_reduction <add>, %90, %cst_23 [0] : vector<2x128xf32> to vector<128xf32>
    %92 = vector.shape_cast %91 : vector<128xf32> to vector<1x128xf32>
    %cst_24 = arith.constant 2.000000e+00 : f32
    %93 = vector.broadcast %cst_24 : f32 to vector<1x128xf32>
    %94 = arith.divf %92, %93 : vector<1x128xf32>
    %95 = vector.broadcast %87 : vector<1x128xf32> to vector<2x128xf32>
    %96 = arith.subf %83, %95 : vector<2x128xf32>
    %cst_25 = arith.constant 9.99999974E-6 : f32
    %97 = vector.broadcast %cst_25 : f32 to vector<1x128xf32>
    %98 = arith.addf %94, %97 : vector<1x128xf32>
    %99 = math.rsqrt %98 : vector<1x128xf32>
    %100 = vector.broadcast %99 : vector<1x128xf32> to vector<2x128xf32>
    %101 = arith.mulf %96, %100 : vector<2x128xf32>
    %c0_26 = arith.constant 0 : index
    %c0_27 = arith.constant 0 : index
    %102 = vector.load %arg4[%c0_26, %c0_27] : memref<1x128xf32, #tpu.memory_space<vmem>>, vector<1x128xf32>
    %103 = vector.broadcast %102 : vector<1x128xf32> to vector<2x128xf32>
    %104 = arith.mulf %101, %103 : vector<2x128xf32>
    %c0_28 = arith.constant 0 : index
    %c0_29 = arith.constant 0 : index
    %105 = vector.load %arg5[%c0_28, %c0_29] : memref<1x128xf32, #tpu.memory_space<vmem>>, vector<1x128xf32>
    %106 = vector.broadcast %105 : vector<1x128xf32> to vector<2x128xf32>
    %107 = arith.addf %104, %106 : vector<2x128xf32>
    %cst_30 = arith.constant 0.000000e+00 : f32
    %108 = vector.broadcast %cst_30 : f32 to vector<2x128xf32>
    %109 = arith.maximumf %107, %108 : vector<2x128xf32>
    %110 = arith.truncf %109 : vector<2x128xf32> to vector<2x128xbf16>
    %c0_31 = arith.constant 0 : index
    %c0_32 = arith.constant 0 : index
    %111 = vector.load %arg6[%c0_31, %c0_32] : memref<128x128xbf16, #tpu.memory_space<vmem>>, vector<128x128xbf16>
    %cst_33 = arith.constant dense<0.000000e+00> : vector<2x128xf32>
    %112 = tpu.matmul %110, %111, %cst_33 {dimension_numbers = #tpu.dot_dimension_numbers<[1], [0], [0], [1], [0, 0, 1, 1], [], []>} : vector<2x128xbf16>, vector<128x128xbf16>, vector<2x128xf32> -> vector<2x128xf32>
    %c0_34 = arith.constant 0 : index
    %c0_35 = arith.constant 0 : index
    %113 = vector.load %arg7[%c0_34, %c0_35] : memref<1x128xf32, #tpu.memory_space<vmem>>, vector<1x128xf32>
    %114 = vector.broadcast %113 : vector<1x128xf32> to vector<2x128xf32>
    %115 = arith.addf %112, %114 : vector<2x128xf32>
    %c0_36 = arith.constant 0 : index
    %c0_37 = arith.constant 0 : index
    %116 = vector.load %arg14[%c0_36, %c0_37] : memref<2x128xf32, #tpu.memory_space<vmem>>, vector<2x128xf32>
    tpu.vector_store %arg14[%c0_36, %c0_37], %115 {strides = array<i32>} : memref<2x128xf32, #tpu.memory_space<vmem>>, vector<2x128xf32>,
    %117 = arith.truncf %115 : vector<2x128xf32> to vector<2x128xbf16>
    %c0_38 = arith.constant 0 : index
    %c0_39 = arith.constant 0 : index
    %118 = vector.load %arg8[%c0_38, %c0_39] : memref<128x128xbf16, #tpu.memory_space<vmem>>, vector<128x128xbf16>
    %cst_40 = arith.constant dense<0.000000e+00> : vector<2x128xf32>
    %119 = tpu.matmul %117, %118, %cst_40 {dimension_numbers = #tpu.dot_dimension_numbers<[1], [0], [0], [1], [0, 0, 1, 1], [], []>} : vector<2x128xbf16>, vector<128x128xbf16>, vector<2x128xf32> -> vector<2x128xf32>
    %cst_41 = arith.constant dense<0.000000e+00> : vector<128xf32>
    %120 = vector.multi_reduction <add>, %119, %cst_41 [0] : vector<2x128xf32> to vector<128xf32>
    %121 = vector.shape_cast %120 : vector<128xf32> to vector<1x128xf32>
    %cst_42 = arith.constant 2.000000e+00 : f32
    %122 = vector.broadcast %cst_42 : f32 to vector<1x128xf32>
    %123 = arith.divf %121, %122 : vector<1x128xf32>
    %124 = vector.broadcast %123 : vector<1x128xf32> to vector<2x128xf32>
    %125 = arith.subf %119, %124 : vector<2x128xf32>
    %126 = arith.mulf %125, %125 : vector<2x128xf32>
    %cst_43 = arith.constant dense<0.000000e+00> : vector<128xf32>
    %127 = vector.multi_reduction <add>, %126, %cst_43 [0] : vector<2x128xf32> to vector<128xf32>
    %128 = vector.shape_cast %127 : vector<128xf32> to vector<1x128xf32>
    %cst_44 = arith.constant 2.000000e+00 : f32
    %129 = vector.broadcast %cst_44 : f32 to vector<1x128xf32>
    %130 = arith.divf %128, %129 : vector<1x128xf32>
    %131 = vector.broadcast %123 : vector<1x128xf32> to vector<2x128xf32>
    %132 = arith.subf %119, %131 : vector<2x128xf32>
    %cst_45 = arith.constant 9.99999974E-6 : f32
    %133 = vector.broadcast %cst_45 : f32 to vector<1x128xf32>
    %134 = arith.addf %130, %133 : vector<1x128xf32>
    %135 = math.rsqrt %134 : vector<1x128xf32>
    %136 = vector.broadcast %135 : vector<1x128xf32> to vector<2x128xf32>
    %137 = arith.mulf %132, %136 : vector<2x128xf32>
    %c0_46 = arith.constant 0 : index
    %c0_47 = arith.constant 0 : index
    %138 = vector.load %arg9[%c0_46, %c0_47] : memref<1x128xf32, #tpu.memory_space<vmem>>, vector<1x128xf32>
    %139 = vector.broadcast %138 : vector<1x128xf32> to vector<2x128xf32>
    %140 = arith.mulf %137, %139 : vector<2x128xf32>
    %c0_48 = arith.constant 0 : index
    %c0_49 = arith.constant 0 : index
    %141 = vector.load %arg10[%c0_48, %c0_49] : memref<1x128xf32, #tpu.memory_space<vmem>>, vector<1x128xf32>
    %142 = vector.broadcast %141 : vector<1x128xf32> to vector<2x128xf32>
    %143 = arith.addf %140, %142 : vector<2x128xf32>
    %cst_50 = arith.constant 0.000000e+00 : f32
    %144 = vector.broadcast %cst_50 : f32 to vector<2x128xf32>
    %145 = arith.maximumf %143, %144 : vector<2x128xf32>
    %146 = arith.truncf %145 : vector<2x128xf32> to vector<2x128xbf16>
    %c0_51 = arith.constant 0 : index
    %c0_52 = arith.constant 0 : index
    %147 = vector.load %arg11[%c0_51, %c0_52] : memref<128x128xbf16, #tpu.memory_space<vmem>>, vector<128x128xbf16>
    %cst_53 = arith.constant dense<0.000000e+00> : vector<2x128xf32>
    %148 = tpu.matmul %146, %147, %cst_53 {dimension_numbers = #tpu.dot_dimension_numbers<[1], [0], [0], [1], [0, 0, 1, 1], [], []>} : vector<2x128xbf16>, vector<128x128xbf16>, vector<2x128xf32> -> vector<2x128xf32>
    %c0_54 = arith.constant 0 : index
    %c0_55 = arith.constant 0 : index
    %149 = vector.load %arg12[%c0_54, %c0_55] : memref<1x128xf32, #tpu.memory_space<vmem>>, vector<1x128xf32>
    %150 = vector.broadcast %149 : vector<1x128xf32> to vector<2x128xf32>
    %151 = arith.addf %148, %150 : vector<2x128xf32>
    %c0_56 = arith.constant 0 : index
    %c0_57 = arith.constant 0 : index
    %152 = vector.load %arg15[%c0_56, %c0_57] : memref<2x128xf32, #tpu.memory_space<vmem>>, vector<2x128xf32>
    tpu.vector_store %arg15[%c0_56, %c0_57], %151 {strides = array<i32>} : memref<2x128xf32, #tpu.memory_space<vmem>>, vector<2x128xf32>,
    return
  }
}

</mosaic_0001>

<bundles_post_ra>
// kernel: siamese_arm_forward.1
= control target key start
LH: loop header
LB: loop body
LE: loop exit
PB: predicated region body
PF: predicated region fallthrough
CT: control target
= control target key end

     0   :  { %21 = vsyncpa [#allocation3], 0  ;;  %v165_v2 = vlaneseq  ;;  %v4120_v3 = vmov 1   ;;  %v4110_v4 = vmov 0   ;;  %v4118_v24 = vmov 2   ;;  %s4094_s0 = inlined_call_operand.vmem [shape: f32[2,4,256], index: 0, kind: input, shape index: {}]   ;;  %s4095_s1 = inlined_call_operand.vmem [shape: f32[128,4], index: 1, kind: input, shape index: {}]   ;;  %s4096_s2 = inlined_call_operand.vmem [shape: f32[128,1], index: 2, kind: input, shape index: {}]   ;;  %s4097_s3 = inlined_call_operand.vmem [shape: bf16[128,128], index: 3, kind: input, shape index: {}]   ;;  %s4098_s4 = inlined_call_operand.vmem [shape: f32[1,128], index: 4, kind: input, shape index: {}]   ;;  %s4099_s5 = inlined_call_operand.vmem [shape: f32[1,128], index: 5, kind: input, shape index: {}]   ;;  %s4100_s6 = inlined_call_operand.vmem [shape: bf16[128,128], index: 6, kind: input, shape index: {}]   ;;  %s4101_s7 = inlined_call_operand.vmem [shape: f32[1,128], index: 7, kind: input, shape index: {}]   ;;  %s4102_s8 = inlined_call_operand.vmem [shape: bf16[128,128], index: 8, kind: input, shape index: {}]   ;;  %s4103_s9 = inlined_call_operand.vmem [shape: f32[1,128], index: 9, kind: input, shape index: {}]   ;;  %s4104_s10 = inlined_call_operand.vmem [shape: f32[1,128], index: 10, kind: input, shape index: {}]   ;;  %s4105_s11 = inlined_call_operand.vmem [shape: bf16[128,128], index: 11, kind: input, shape index: {}]   ;;  %s4106_s12 = inlined_call_operand.vmem [shape: f32[1,128], index: 12, kind: input, shape index: {}]   ;;  %s4107_s13 = inlined_call_operand.hbm [shape: f32[2,128], index: 13, kind: output, shape index: {0}]   ;;  %s4108_s14 = inlined_call_operand.hbm [shape: f32[2,128], index: 14, kind: output, shape index: {1}]   ;;  %s4109_s15 = inlined_call_operand.hbm [shape: f32[2,128], index: 15, kind: output, shape index: {2}]  }
   0x1   :  { %v81_v0 = vld [vmem:[%s4096_s2 + $0x70] sm:$0xff]  ;;  %2241 = vset.pattern.permute.xlu0 %v4120_v3  ;;  %2240 = vset.pattern.permute.xlu1 %v4110_v4  ;;  %v82_v6 = vld [vmem:[%s4096_s2 + $0x78] sm:$0xff]  ;;  %v2487_v7 = vld [vmem:[%s4095_s1 + $0x68] sm:$0xff]  ;;  %v4112_v27 = vmov 3  }
   0x2   :  { %v2474_v1 = vld [vmem:[%s4095_s1 + $0x70] sm:$0xff]  ;;  %287 = vperm.xlu1 %2240, %v81_v0   ;;  %v2479_v5 = vshrl.u32 %v165_v2, 7  ;;  %v2500_v11 = vld [vmem:[%s4095_s1 + $0x78] sm:$0xff]  ;;  %v2508_v13 = vld [vmem:[%s4094_s0 + $0x8] sm:$0xff] }
   0x3   :  { %384 = vperm.xlu0 %2241, %v2474_v1   ;;  %v2495_v10 = vld [vmem:[%s4095_s1 + $0x50] sm:$0xff]  ;;  %v2516_v15 = vld [vmem:[%s4095_s1 + $0x48] sm:$0xff]  ;;  %v63_v31 = vld [vmem:[%s4095_s1 + $0x60] sm:$0xff] }
   0x4   :  { %v4117_v8 = vsub.s32 5, %v2479_v5  ;;  %v4116_v9 = vsub.s32 6, %v2479_v5  ;;  %v2503_v12 = vsub.s32 1, %v2479_v5  ;;  %v2511_v14 = vsub.s32 2, %v2479_v5  ;;  %v2540_v22 = vld [vmem:[%s4095_s1 + $0x30] sm:$0xff]  ;;  %v2554_v26 = vld [vmem:[%s4095_s1 + $0x28] sm:$0xff] }
   0x5   :  { %v2534_v20 = vsub.s32 3, %v2479_v5  ;;  %v4115_v21 = vsub.s32 7, %v2479_v5  ;;  %v2559_v28 = vsub.s32 0, %v2479_v5  ;;  %v4114_v29 = vsub.s32 4, %v2479_v5  ;;  %v59_v33 = vld [vmem:[%s4095_s1 + $0x40] sm:$0xff] }
   0x6   :  { %292 = vperm.xlu1 %2240, %v82_v6   ;;  %v1066_v16 = vrot.slane %v2508_v13, %v4117_v8  ;;  %v1148_v17 = vrot.slane %v2508_v13, %v4116_v9  ;;  %v79_v34 = vld [vmem:[%s4096_s2 + $0x60] sm:$0xff] }
   0x7   :  { %380 = vperm.xlu0 %2241, %v2487_v7   ;;  %v1230_v23 = vrot.slane %v2508_v13, %v4115_v21  ;;  %v984_v30 = vrot.slane %v2508_v13, %v4114_v29 }
   0x8   :  { %v2528_v18 = vrot.slane %v1066_v16, %v2503_v12  ;;  %v2531_v19 = vrot.slane %v1148_v17, %v2511_v14 }
   0x9   :  { %v2549_v25 = vrot.slane %v1230_v23, %v2534_v20  ;;  %v2571_v32 = vrot.slane %v984_v30, %v2559_v28 }
   0xa   :  { %2242 = vset.pattern.permute.xlu1 %v4120_v3  ;;  %4196 = vst [vmem:[#allocation9_spill] sm:$0xff] %v2528_v18  ;;  %4197 = vst [vmem:[#allocation10_spill] sm:$0xff] %v2531_v19 }
   0xb   :  { %368 = vperm.xlu0 %2241, %v2495_v10   ;;  %388 = vperm.xlu1 %2242, %v2500_v11   ;;  %4198 = vst [vmem:[#allocation11_spill] sm:$0xff] %v2549_v25  ;;  %4199 = vst [vmem:[#allocation12_spill] sm:$0xff] %v2571_v32 }
   0xf   :  { %364 = vperm.xlu0 %2241, %v2516_v15   ;;  %2243 = vset.pattern.permute.xlu1 %v4118_v24 }
  0x10   :  { %530 = vperm.xlu1 %2243, %v2474_v1  }
  0x13   :  { %352 = vperm.xlu0 %2241, %v2540_v22  }
  0x14   :  { %2244 = vset.pattern.permute.xlu1 %v4112_v27 }
  0x15   :  { %676 = vperm.xlu1 %2244, %v2474_v1  }
  0x17   :  { %348 = vperm.xlu0 %2241, %v2554_v26  }
  0x19   :  { %680 = vperm.xlu1 %2244, %v2500_v11  }
  0x1b   :  { %2263 = vset.pattern.permute.xlu0 %v4112_v27 }
  0x1c   :  { %668 = vperm.xlu0 %2263, %v63_v31  }
  0x1d   :  { %2245 = vset.pattern.permute.xlu1 %v4110_v4 }
  0x1e   :  { %151 = vperm.xlu1 %2245, %v2487_v7  }
  0x20   :  { %652 = vperm.xlu0 %2263, %v59_v33  }
  0x21   :  { %22 = vsyncpa [#allocation5], 0  ;;  %v2586_v35 = vld [vmem:[%s4095_s1 + $0x20] sm:$0xff]  ;;  %v62_v36 = vld [vmem:[%s4095_s1 + $0x58] sm:$0xff]  ;;  %v1062_v50 = vrot.slane %v2508_v13, %v2503_v12  ;;  %v1144_v61 = vrot.slane %v2508_v13, %v2511_v14  ;;  %vm2384_vm0 = vmmov 0   ;;  %vm1517_vm1 = vcmask 1040384  }
  0x22   :  { %277 = vperm.xlu1 %2245, %v79_v34   ;;  %v2599_v37 = vld [vmem:[%s4095_s1 + $0x38] sm:$0xff]  ;;  %v77_v39 = vld [vmem:[%s4096_s2 + $0x50] sm:$0xff]  ;;  %v80_v41 = vld [vmem:[%s4096_s2 + $0x68] sm:$0xff]  ;;  %vm1625_vm2 = vcmask 1041408   ;;  %s2385_s17 = smov [#allocation4]  }
  0x23   :  { %v2606_v38 = vld [vmem:[%s4095_s1 + $0x18] sm:$0xff]  ;;  %v76_v42 = vld [vmem:[%s4096_s2 + $0x48] sm:$0xff]  ;;  %v75_v44 = vld [vmem:[%s4096_s2 + $0x40] sm:$0xff]  ;;  %v2684_v52 = vrot.slane %v1062_v50, %v2503_v12  ;;  %s2050_s18 = sshll.u32 %s2385_s17, 4  ;;  %s2051_s18 = int_to_ptr.vmem [resolvable:$true] %s2050_s18 }
  0x24   :  { %636 = vperm.xlu0 %2263, %v2586_v35   ;;  %v78_v40 = vld [vmem:[%s4096_s2 + $0x58] sm:$0xff]  ;;  %v72_v43 = vld [vmem:[%s4096_s2 + $0x28] sm:$0xff]  ;;  %v2648_v45 = vld [vmem:[%s4095_s1] sm:$0xff]  ;;  %p2319_p1 = scmp.lt.s32.totalorder %s2051_s18, %s2051_s18 }
  0x25   :  { %4200 = vst [vmem:[#allocation13_spill] sm:$0xff] %v2648_v45  ;;  %v68_v46 = vld [vmem:[%s4096_s2 + $0x8] sm:$0xff]  ;;  %v2659_v47 = vld [vmem:[%s4095_s1 + $0x10] sm:$0xff]  ;;  %v74_v51 = vld [vmem:[%s4096_s2 + $0x38] sm:$0xff] }
  0x26   :  { %2246 = vset.pattern.permute.xlu1 %v4120_v3  ;;  %v2668_v48 = vld [vmem:[%s4095_s1 + $0x8] sm:$0xff]  ;;  %v73_v49 = vld [vmem:[%s4096_s2 + $0x30] sm:$0xff] }
  0x27   :  { %376 = vperm.xlu1 %2246, %v63_v31   ;;  %4201 = vst [vmem:[#allocation14_spill] sm:$0xff] %v2668_v48 }
  0x28   :  { %2265 = vset.pattern.permute.xlu0 %v4118_v24 }
  0x29   :  { %534 = vperm.xlu0 %2265, %v2500_v11  }
  0x2b   :  { %2247 = vset.pattern.permute.xlu1 %v4118_v24 }
  0x2c   :  { %522 = vperm.xlu1 %2247, %v63_v31  }
  0x2d   :  { %518 = vperm.xlu0 %2265, %v62_v36  }
  0x30   :  { %526 = vperm.xlu1 %2247, %v2487_v7  }
  0x31   :  { %502 = vperm.xlu0 %2265, %v2599_v37  }
  0x34   :  { %2248 = vset.pattern.permute.xlu1 %v4112_v27 }
  0x35   :  { %486 = vperm.xlu0 %2265, %v2606_v38   ;;  %672 = vperm.xlu1 %2248, %v2487_v7   ;;  %v2737_v7 = vrot.slane %v1144_v61, %v2511_v14 }
  0x37   :  { %4202 = vst [vmem:[#allocation15_spill] sm:$0xff] %v2737_v7 }
  0x39   :  { %2270 = vset.pattern.permute.xlu0 %v4110_v4  ;;  %2249 = vset.pattern.permute.xlu1 %v4110_v4 }
  0x3a   :  { %156 = vperm.xlu0 %2270, %v2474_v1   ;;  %136 = vperm.xlu1 %2249, %v2495_v10  }
  0x3e   :  { %161 = vperm.xlu0 %2270, %v2500_v11   ;;  %267 = vperm.xlu1 %2249, %v77_v39   ;;  %v1226_v11 = vrot.slane %v2508_v13, %v2534_v20 }
  0x42   :  { %146 = vperm.xlu0 %2270, %v63_v31   ;;  %272 = vperm.xlu1 %2249, %v78_v40   ;;  %v2764_v31 = vrot.slane %v1226_v11, %v2534_v20  ;;  %v71_v11 = vld [vmem:[%s4096_s2 + $0x20] sm:$0xff] }
  0x44   :  { %4206 = vst [vmem:[#allocation19_spill] sm:$0xff] %v2764_v31 }
  0x46   :  { %282 = vperm.xlu0 %2270, %v80_v41   ;;  %2250 = vset.pattern.permute.xlu1 %v4120_v3 }
  0x47   :  { %372 = vperm.xlu1 %2250, %v62_v36  }
  0x4a   :  { %141 = vperm.xlu0 %2270, %v62_v36  }
  0x4b   :  { %2251 = vset.pattern.permute.xlu1 %v4118_v24 }
  0x4c   :  { %514 = vperm.xlu1 %2251, %v2495_v10  }
  0x4e   :  { %126 = vperm.xlu0 %2270, %v59_v33  }
  0x50   :  { %2252 = vset.pattern.permute.xlu1 %v4112_v27 }
  0x51   :  { %660 = vperm.xlu1 %2252, %v2495_v10  }
  0x52   :  { %262 = vperm.xlu0 %2270, %v76_v42  }
  0x55   :  { %664 = vperm.xlu1 %2252, %v62_v36  }
  0x56   :  { %121 = vperm.xlu0 %2270, %v2599_v37  }
  0x59   :  { %2253 = vset.pattern.permute.xlu1 %v4110_v4 }
  0x5a   :  { %106 = vperm.xlu0 %2270, %v2586_v35   ;;  %131 = vperm.xlu1 %2253, %v2516_v15  }
  0x5e   :  { %242 = vperm.xlu0 %2270, %v72_v43   ;;  %257 = vperm.xlu1 %2253, %v75_v44   ;;  %v980_v44 = vrot.slane %v2508_v13, %v2559_v28 }
  0x62   :  { %101 = vperm.xlu0 %2270, %v2606_v38   ;;  %2254 = vset.pattern.permute.xlu1 %v4120_v3 }
  0x63   :  { %360 = vperm.xlu1 %2254, %v59_v33  }
  0x66   :  { %86 = vperm.xlu0 %2270, %v2648_v45  }
  0x67   :  { %2255 = vset.pattern.permute.xlu1 %v4118_v24 }
  0x68   :  { %506 = vperm.xlu1 %2255, %v59_v33  }
  0x6a   :  { %222 = vperm.xlu0 %2270, %v68_v46  }
  0x6c   :  { %510 = vperm.xlu1 %2255, %v2516_v15  }
  0x6e   :  { %2273 = vset.pattern.permute.xlu0 %v4120_v3 }
  0x6f   :  { %336 = vperm.xlu0 %2273, %v2659_v47  }
  0x70   :  { %2256 = vset.pattern.permute.xlu1 %v4112_v27 }
  0x71   :  { %656 = vperm.xlu1 %2256, %v2516_v15  }
  0x73   :  { %332 = vperm.xlu0 %2273, %v2668_v48  }
  0x75   :  { %2257 = vset.pattern.permute.xlu1 %v4110_v4 }
  0x76   :  { %116 = vperm.xlu1 %2257, %v2540_v22  }
  0x77   :  { %2276 = vset.pattern.permute.xlu0 %v4112_v27 }
  0x78   :  { %620 = vperm.xlu0 %2276, %v2648_v45  }
  0x7a   :  { %247 = vperm.xlu1 %2257, %v73_v49  }
  0x7d   :  { %v2686_v53 = vpop.permute.xlu1 %287 }
  0x7e   :  { %v2688_v54 = vpop.permute.xlu0 %384  ;;  %252 = vperm.xlu1 %2257, %v74_v51   ;;  %v2814_v51 = vrot.slane %v980_v44, %v2559_v28 }
  0x7f   :  { %v2692_v55 = vmul.f32 %v2684_v52, %v2688_v54  ;;  %v2696_v56 = vmul.f32 %v2528_v18, %v2688_v54 }
  0x81   :  { %v2698_v57 = vpop.permute.xlu1 %292 }
  0x82   :  { %v2700_v58 = vpop.permute.xlu0 %380  ;;  %2258 = vset.pattern.permute.xlu1 %v4120_v3 }
  0x83   :  { %v2705_v59 = vmul.f32 %v2684_v52, %v2700_v58  ;;  %v2709_v60 = vmul.f32 %v2528_v18, %v2700_v58  ;;  %356 = vperm.xlu1 %2258, %v2599_v37  }
  0x86   :  { %v2714_v62 = vpop.permute.xlu0 %368  ;;  %v2716_v63 = vpop.permute.xlu1 %388 }
  0x87   :  { %v2720_v0 = vmul.f32 %v2684_v52, %v2714_v62  ;;  %v2724_v1 = vmul.f32 %v2528_v18, %v2714_v62  ;;  %v2728_v2 = vmul.f32 %v2684_v52, %v2716_v63  ;;  %v2732_v6 = vmul.f32 %v2528_v18, %v2716_v63  ;;  %2259 = vset.pattern.permute.xlu1 %v4118_v24 }
  0x88   :  { %498 = vperm.xlu1 %2259, %v2540_v22  }
  0x8a   :  { %v2739_v10 = vpop.permute.xlu0 %364 }
  0x8b   :  { %v2745_v15 = vmul.f32 %v2684_v52, %v2739_v10  ;;  %v2749_v16 = vmul.f32 %v2528_v18, %v2739_v10  ;;  %v2751_v17 = vpop.permute.xlu1 %530 }
  0x8c   :  { %v2755_v23 = vmul.f32 %v2737_v7, %v2751_v17  ;;  %v2759_v30 = vmul.f32 %v2531_v19, %v2751_v17  ;;  %2260 = vset.pattern.permute.xlu1 %v4112_v27 }
  0x8d   :  { %4203 = vst [vmem:[#allocation16_spill] sm:$0xff] %v2745_v15  ;;  %4204 = vst [vmem:[#allocation17_spill] sm:$0xff] %v2749_v16  ;;  %644 = vperm.xlu1 %2260, %v2540_v22   ;;  %v4229_v16 = vsub.s32 4, %v2479_v5 }
  0x8e   :  { %4205 = vst [vmem:[#allocation18_spill] sm:$0xff] %v2759_v30  ;;  %v2766_v33 = vpop.permute.xlu0 %352 }
  0x8f   :  { %4207 = vst [vmem:[#allocation20_spill] sm:$0xff] %v2766_v33  ;;  %v2770_v34 = vmul.f32 %v2684_v52, %v2766_v33  ;;  %v2774_v36 = vmul.f32 %v2528_v18, %v2766_v33 }
  0x90   :  { %v2776_v39 = vpop.permute.xlu1 %676 }
  0x91   :  { %4208 = vst [vmem:[#allocation21_spill] sm:$0xff] %v2770_v34  ;;  %4209 = vst [vmem:[#allocation22_spill] sm:$0xff] %v2774_v36  ;;  %v2780_v40 = vmul.f32 %v2764_v31, %v2776_v39  ;;  %v2784_v22 = vmul.f32 %v2549_v25, %v2776_v39  ;;  %648 = vperm.xlu1 %2260, %v2599_v37   ;;  %v4227_v36 = vsub.s32 6, %v2479_v5 }
  0x92   :  { %v2787_v41 = vpop.permute.xlu0 %348 }
  0x93   :  { %4210 = vst [vmem:[#allocation23_spill] sm:$0xff] %v2780_v40  ;;  %4211 = vst [vmem:[#allocation24_spill] sm:$0xff] %v2784_v22  ;;  %v2791_v42 = vmul.f32 %v2684_v52, %v2787_v41  ;;  %v2795_v43 = vmul.f32 %v2528_v18, %v2787_v41 }
  0x94   :  { %4212 = vst [vmem:[#allocation25_spill] sm:$0xff] %v2787_v41  ;;  %v2799_v46 = vpop.permute.xlu1 %680  ;;  %v4228_v41 = vsub.s32 7, %v2479_v5 }
  0x95   :  { %4213 = vst [vmem:[#allocation26_spill] sm:$0xff] %v2791_v42  ;;  %4214 = vst [vmem:[#allocation27_spill] sm:$0xff] %v2795_v43  ;;  %v2803_v49 = vmul.f32 %v2764_v31, %v2799_v46  ;;  %v2807_v37 = vmul.f32 %v2549_v25, %v2799_v46  ;;  %2261 = vset.pattern.permute.xlu1 %v4110_v4 }
  0x96   :  { %111 = vperm.xlu1 %2261, %v2554_v26  }
  0x97   :  { %4215 = vst [vmem:[#allocation28_spill] sm:$0xff] %v2803_v49  ;;  %4216 = vst [vmem:[#allocation29_spill] sm:$0xff] %v2807_v37  ;;  %v2811_v50 = vpop.permute.xlu0 %668  ;;  %v4226_v49 = vsub.s32 5, %v2479_v5 }
  0x98   :  { %v2818_v13 = vmul.f32 %v2764_v31, %v2811_v50  ;;  %v2822_v61 = vmul.f32 %v2549_v25, %v2811_v50 }
  0x99   :  { %v2827_v4 = vpop.permute.xlu1 %151 }
  0x9a   :  { %4217 = vst [vmem:[#allocation30_spill] sm:$0xff] %v2818_v13  ;;  %4218 = vst [vmem:[#allocation31_spill] sm:$0xff] %v2822_v61  ;;  %v2831_v27 = vmul.f32 %v2814_v51, %v2827_v4  ;;  %v2835_v44 = vmul.f32 %v2571_v32, %v2827_v4  ;;  %237 = vperm.xlu1 %2261, %v71_v11   ;;  %v4224_v61 = vmov 2  }
  0x9b   :  { %v2837_v29 = vpop.permute.xlu0 %652 }
  0x9c   :  { %v2841_v21 = vmul.f32 %v2764_v31, %v2837_v29  ;;  %v2845_v9 = vmul.f32 %v2549_v25, %v2837_v29 }
  0x9d   :  { %v2847_v8 = vpop.permute.xlu1 %277 }
  0x9e   :  { %4219 = vst [vmem:[#allocation32_spill] sm:$0xff] %v2841_v21  ;;  %4220 = vst [vmem:[#allocation33_spill] sm:$0xff] %v2845_v9  ;;  %2262 = vset.pattern.permute.xlu1 %v4120_v3  ;;  %v83_v9 = vld [vmem:[%s4094_s0] sm:$0xff]  ;;  %s2314_s0 = scalar_lea.vmem %s2051_s18, 32 }
  0x9f   :  { %v2850_v24 = vpop.permute.xlu0 %636  ;;  %344 = vperm.xlu1 %2262, %v2586_v35   ;;  %v394_v22 = vrot.slane %v83_v9, %v2503_v12  ;;  %v398_v40 = vrot.slane %v83_v9, %v4226_v49  ;;  %v540_v30 = vrot.slane %v83_v9, %v2511_v14  ;;  %v544_v34 = vrot.slane %v83_v9, %v4227_v36  ;;  %p2315_p0 = scmp.ne.s32.totalorder %s2051_s18, %s2314_s0  ;;  %p2320_p2 = scmp.lt.s32.totalorder %s2314_s0, %s2314_s0 }
  0xa0   :  { %4221 = vst [vmem:[#allocation34_spill] sm:$0xff] %v2850_v24  ;;  %v2855_v11 = vmul.f32 %v2764_v31, %v2850_v24  ;;  %v2859_v43 = vmul.f32 %v2549_v25, %v2850_v24  ;;  %v686_v24 = vrot.slane %v83_v9, %v2534_v20  ;;  %v690_v33 = vrot.slane %v83_v9, %v4228_v41 }
  0xa1   :  { %v172_v15 = vrot.slane %v83_v9, %v4229_v16  ;;  %v2920_v5 = vrot.slane %v394_v22, %v2503_v12  ;;  %v2926_v16 = vrot.slane %v540_v30, %v2511_v14  ;;  %p2321_p3 = por %p2320_p2, %p2319_p1 }
  0xa2   :  { %4222 = vst [vmem:[#allocation35_spill] sm:$0xff] %v2855_v11  ;;  %4223 = vst [vmem:[#allocation36_spill] sm:$0xff] %v2859_v43  ;;  %v2861_v42 = vpop.permute.xlu1 %376  ;;  %v2932_v48 = vrot.slane %v686_v24, %v2534_v20  ;;  %v4242_v24 = vmov 3  }
  0xa3   :  { %v2868_v3 = vmul.f32 %v2684_v52, %v2861_v42  ;;  %v2872_v13 = vmul.f32 %v2528_v18, %v2861_v42  ;;  %2264 = vset.pattern.permute.xlu1 %v4224_v61  ;;  %4233 = vst [vmem:[#allocation41_spill] sm:$0xff] %v2920_v5  ;;  %4235 = vst [vmem:[#allocation43_spill] sm:$0xff] %v2926_v16  ;;  %p2322_p4 = pnand %p2321_p3, %p2315_p0 }
  0xa4   :  { %v2875_v11 = vpop.permute.xlu0 %534  ;;  %490 = vperm.xlu1 %2264, %v2586_v35   ;;  %v168_v35 = vrot.slane %v83_v9, %v2559_v28  ;;  %v2923_v9 = vrot.slane %v398_v40, %v2503_v12  ;;  %4236 = vst [vmem:[#allocation44_spill] sm:$0xff] %v2932_v48  ;;  %v2943_v12 = vrot.slane %v172_v15, %v2559_v28 }
  0xa5   :  { %v2879_v43 = vmul.f32 %v2737_v7, %v2875_v11  ;;  %v2883_v37 = vmul.f32 %v2531_v19, %v2875_v11 }
  0xa6   :  { %4234 = vst [vmem:[#allocation42_spill] sm:$0xff] %v2923_v9  ;;  %v2940_v22 = vrot.slane %v168_v35, %v2559_v28  ;;  %4240 = vst [vmem:[#allocation48_spill] sm:$0xff] %v2943_v12  ;;  %v2975_v40 = vmul.f32 %v2923_v9, %v2700_v58  ;;  %v2983_v35 = vmul.f32 %v2923_v9, %v2714_v62 }
  0xa7   :  { %4225 = vst [vmem:[#allocation37_spill] sm:$0xff] %v2883_v37  ;;  %v2895_v21 = vpop.permute.xlu1 %522 }
  0xa8   :  { %v2897_v37 = vpop.permute.xlu0 %518  ;;  %v2904_v49 = vmul.f32 %v2737_v7, %v2895_v21  ;;  %v2908_v36 = vmul.f32 %v2531_v19, %v2895_v21  ;;  %494 = vperm.xlu1 %2264, %v2554_v26   ;;  %4239 = vst [vmem:[#allocation47_spill] sm:$0xff] %v2940_v22 }
  0xa9   :  { %v2913_v41 = vmul.f32 %v2737_v7, %v2897_v37  ;;  %v2917_v45 = vmul.f32 %v2531_v19, %v2897_v37 }
  0xaa   :  { %4230 = vst [vmem:[#allocation38_spill] sm:$0xff] %v2908_v36  ;;  %v2929_v36 = vrot.slane %v544_v34, %v2511_v14  ;;  %v2971_v34 = vmul.f32 %v2920_v5, %v2700_v58  ;;  %v2995_v58 = vmul.f32 %v2920_v5, %v2739_v10 }
  0xab   :  { %4231 = vst [vmem:[#allocation39_spill] sm:$0xff] %v2913_v41  ;;  %4232 = vst [vmem:[#allocation40_spill] sm:$0xff] %v2917_v45  ;;  %v2935_v41 = vrot.slane %v690_v33, %v2534_v20  ;;  %v527_v18 = vpop.permute.xlu1 %526  ;;  %v2954_v20 = vmul.f32 %v2920_v5, %v2688_v54  ;;  %v2958_v33 = vmul.f32 %v2923_v9, %v2688_v54 }
  0xac   :  { %v2937_v45 = vpop.permute.xlu0 %502  ;;  %v2946_v30 = vmul.f32 %v2737_v7, %v527_v18  ;;  %v2949_v14 = vmul.f32 %v2531_v19, %v527_v18  ;;  %2266 = vset.pattern.permute.xlu1 %v4242_v24  ;;  %v2979_v54 = vmul.f32 %v2920_v5, %v2714_v62  ;;  %4245 = vst [vmem:[#allocation52_spill] sm:$0xff] %v2995_v58 }
  0xad   :  { %4237 = vst [vmem:[#allocation45_spill] sm:$0xff] %v2935_v41  ;;  %4238 = vst [vmem:[#allocation46_spill] sm:$0xff] %v2937_v45  ;;  %v2962_v28 = vmul.f32 %v2737_v7, %v2937_v45  ;;  %v2966_v15 = vmul.f32 %v2531_v19, %v2937_v45  ;;  %640 = vperm.xlu1 %2266, %v2554_v26   ;;  %v2991_v26 = vmul.f32 %v2923_v9, %v2716_v63 }
  0xae   :  { %4241 = vst [vmem:[#allocation49_spill] sm:$0xff] %v2949_v14  ;;  %v3005_v62 = vmul.f32 %v2926_v16, %v2751_v17  ;;  %v3009_v45 = vmul.f32 %v2929_v36, %v2751_v17 }
  0xaf   :  { %4243 = vst [vmem:[#allocation50_spill] sm:$0xff] %v2962_v28  ;;  %4244 = vst [vmem:[#allocation51_spill] sm:$0xff] %v2966_v15  ;;  %v2987_v15 = vmul.f32 %v2920_v5, %v2716_v63  ;;  %v2999_v28 = vmul.f32 %v2923_v9, %v2739_v10  ;;  %v3021_v10 = vmul.f32 %v2932_v48, %v2776_v39 }
  0xb0   :  { %v3001_v14 = vpop.permute.xlu0 %486  ;;  %4248 = vst [vmem:[#allocation55_spill] sm:$0xff] %v3005_v62  ;;  %v673_v63 = vpop.permute.xlu1 %672 }
  0xb1   :  { %4246 = vst [vmem:[#allocation53_spill] sm:$0xff] %v2999_v28  ;;  %4247 = vst [vmem:[#allocation54_spill] sm:$0xff] %v3001_v14  ;;  %v3013_v24 = vmul.f32 %v2737_v7, %v3001_v14  ;;  %v3017_v58 = vmul.f32 %v2531_v19, %v3001_v14  ;;  %v3025_v28 = vmul.f32 %v2935_v41, %v2776_v39  ;;  %v4255_v7 = vmov 0  }
  0xb2   :  { %4251 = vst [vmem:[#allocation58_spill] sm:$0xff] %v3021_v10  ;;  %v3028_v17 = vmul.f32 %v2764_v31, %v673_v63  ;;  %v3031_v62 = vmul.f32 %v2549_v25, %v673_v63  ;;  %2267 = vset.pattern.permute.xlu1 %v4255_v7  ;;  %v3036_v14 = vmul.f32 %v2932_v48, %v2799_v46 }
  0xb3   :  { %4249 = vst [vmem:[#allocation56_spill] sm:$0xff] %v3013_v24  ;;  %4250 = vst [vmem:[#allocation57_spill] sm:$0xff] %v3017_v58  ;;  %v3040_v58 = vmul.f32 %v2935_v41, %v2799_v46  ;;  %v3044_v39 = vmul.f32 %v2932_v48, %v2811_v50  ;;  %v3048_v24 = vmul.f32 %v2935_v41, %v2811_v50  ;;  %96 = vperm.xlu1 %2267, %v2659_v47   ;;  %v69_v50 = vld [vmem:[%s4096_s2 + $0x10] sm:$0xff] }
  0xb4   :  { %4252 = vst [vmem:[#allocation59_spill] sm:$0xff] %v3025_v28  ;;  %4253 = vst [vmem:[#allocation60_spill] sm:$0xff] %v3028_v17  ;;  %v3053_v17 = vmul.f32 %v2940_v22, %v2827_v4  ;;  %v3061_v46 = vmul.f32 %v2932_v48, %v2837_v29  ;;  %v3072_v7 = vmul.f32 %v2920_v5, %v2861_v42 }
  0xb5   :  { %4254 = vst [vmem:[#allocation61_spill] sm:$0xff] %v3031_v62  ;;  %4256 = vst [vmem:[#allocation62_spill] sm:$0xff] %v3036_v14  ;;  %v3057_v62 = vmul.f32 %v2943_v12, %v2827_v4  ;;  %v3076_v4 = vmul.f32 %v2923_v9, %v2861_v42  ;;  %v137_v31 = vpop.permute.xlu1 %136  ;;  %v3092_v42 = vmul.f32 %v2926_v16, %v2895_v21 }
  0xb6   :  { %4257 = vst [vmem:[#allocation63_spill] sm:$0xff] %v3040_v58  ;;  %4258 = vst [vmem:[#allocation64_spill] sm:$0xff] %v3044_v39  ;;  %v3065_v39 = vmul.f32 %v2935_v41, %v2837_v29  ;;  %v3084_v29 = vmul.f32 %v2929_v36, %v2875_v11  ;;  %v1016_v9 = vmul.f32 %v2571_v32, %v137_v31 }
  0xb7   :  { %4259 = vst [vmem:[#allocation65_spill] sm:$0xff] %v3048_v24  ;;  %4260 = vst [vmem:[#allocation66_spill] sm:$0xff] %v3061_v46  ;;  %v3080_v24 = vmul.f32 %v2926_v16, %v2875_v11  ;;  %v157_v46 = vpop.permute.xlu0 %156  ;;  %v1015_v11 = vmul.f32 %v2814_v51, %v137_v31  ;;  %227 = vperm.xlu1 %2267, %v69_v50   ;;  %v3102_v5 = vmul.f32 %v2926_v16, %v2897_v37 }
  0xb8   :  { %4261 = vst [vmem:[#allocation67_spill] sm:$0xff] %v3065_v39  ;;  %v211_v39 = vmul.f32 %v2940_v22, %v157_v46  ;;  %v212_v14 = vmul.f32 %v2943_v12, %v157_v46  ;;  %v1023_v10 = vmul.f32 %v2814_v51, %v157_v46  ;;  %v1024_v25 = vmul.f32 %v2571_v32, %v157_v46 }
  0xb9   :  { %4262 = vst [vmem:[#allocation68_spill] sm:$0xff] %v3080_v24  ;;  %4263 = vst [vmem:[#allocation69_spill] sm:$0xff] %v3092_v42  ;;  %v3096_v24 = vmul.f32 %v2929_v36, %v2895_v21  ;;  %v3106_v46 = vmul.f32 %v2929_v36, %v2897_v37  ;;  %v70_v21 = vld [vmem:[%s4096_s2 + $0x18] sm:$0xff]  ;;  %v3117_v50 = vmul.f32 %v2929_v36, %v527_v18 }
  0xba   :  { %4265 = vst [vmem:[#allocation71_spill] sm:$0xff] %v3102_v5  ;;  %v1055_v19 = vadd.f32 %v1023_v10, %v2686_v53  ;;  %v1056_v42 = vadd.f32 %v1024_v25, %v2686_v53  ;;  %v3120_v5 = vmul.f32 %v2932_v48, %v673_v63  ;;  %v203_v37 = vmul.f32 %v2940_v22, %v137_v31 }
  0xbb   :  { %4264 = vst [vmem:[#allocation70_spill] sm:$0xff] %v3096_v24  ;;  %4266 = vst [vmem:[#allocation72_spill] sm:$0xff] %v3106_v46  ;;  %v3114_v24 = vmul.f32 %v2926_v16, %v527_v18  ;;  %v162_v46 = vpop.permute.xlu0 %161  ;;  %v323_v10 = vadd.f32 %v2686_v53, %v211_v39  ;;  %v324_v25 = vadd.f32 %v2686_v53, %v212_v14  ;;  %v268_v16 = vpop.permute.xlu1 %267  ;;  %232 = vperm.xlu1 %2267, %v70_v21  }
  0xbc   :  { %4268 = vst [vmem:[#allocation74_spill] sm:$0xff] %v3117_v50  ;;  %4269 = vst [vmem:[#allocation75_spill] sm:$0xff] %v3120_v5  ;;  %v1137_v58 = vadd.f32 %v2692_v55, %v1055_v19  ;;  %v3127_v28 = vadd.f32 %v2696_v56, %v1056_v42  ;;  %v214_v18 = vmul.f32 %v2943_v12, %v162_v46 }
  0xbd   :  { %4267 = vst [vmem:[#allocation73_spill] sm:$0xff] %v3114_v24  ;;  %v213_v24 = vmul.f32 %v2940_v22, %v162_v46  ;;  %v1025_v48 = vmul.f32 %v2814_v51, %v162_v46  ;;  %v1026_v5 = vmul.f32 %v2571_v32, %v162_v46  ;;  %v3134_v50 = vmul.f32 %v2935_v41, %v673_v63 }
  0xbe   :  { %4270 = vst [vmem:[#allocation76_spill] sm:$0xff] %v3127_v28  ;;  %v3137_v53 = vadd.f32 %v2755_v23, %v1137_v58  ;;  %v204_v19 = vmul.f32 %v2943_v12, %v137_v31  ;;  %v1047_v55 = vadd.f32 %v1015_v11, %v268_v16  ;;  %v326_v56 = vadd.f32 %v2698_v57, %v214_v18 }
  0xbf   :  { %v1057_v14 = vadd.f32 %v1025_v48, %v2698_v57  ;;  %v1058_v39 = vadd.f32 %v1026_v5, %v2698_v57  ;;  %v315_v42 = vadd.f32 %v268_v16, %v203_v37  ;;  %v147_v28 = vpop.permute.xlu0 %146  ;;  %v3144_v46 = vadd.f32 %v2954_v20, %v323_v10  ;;  %v273_v23 = vpop.permute.xlu1 %272 }
  0xc0   :  { %v316_v21 = vadd.f32 %v268_v16, %v204_v19  ;;  %v1048_v63 = vadd.f32 %v1016_v9, %v268_v16  ;;  %v3147_v41 = vadd.f32 %v2720_v0, %v1047_v55  ;;  %v470_v31 = vadd.f32 %v2958_v33, %v324_v25 }
  0xc1   :  { %v325_v58 = vadd.f32 %v2698_v57, %v213_v24  ;;  %v1139_v11 = vadd.f32 %v2728_v2, %v1057_v14  ;;  %v3153_v48 = vadd.f32 %v2732_v6, %v1058_v39  ;;  %v4271_v5 = vmov 1  }
  0xc2   :  { %2268 = vset.pattern.permute.xlu1 %v4271_v5  ;;  %v1130_v20 = vadd.f32 %v2724_v1, %v1048_v63  ;;  %v207_v37 = vmul.f32 %v2940_v22, %v147_v28  ;;  %v208_v9 = vmul.f32 %v2943_v12, %v147_v28  ;;  %v1019_v0 = vmul.f32 %v2814_v51, %v147_v28 }
  0xc3   :  { %340 = vperm.xlu1 %2268, %v2606_v38   ;;  %v472_v16 = vadd.f32 %v2991_v26, %v326_v56  ;;  %v3163_v57 = vadd.f32 %v2879_v43, %v1139_v11  ;;  %v3166_v2 = vadd.f32 %v2979_v54, %v315_v42  ;;  %v1020_v6 = vmul.f32 %v2571_v32, %v147_v28  ;;  %v283_v24 = vpop.permute.xlu0 %282  ;;  %v373_v19 = vpop.permute.xlu1 %372  ;;  %v4278_v11 = vld [vmem:[#allocation63_spill] sm:$0xff] }
  0xc4   :  { %v3170_v1 = vadd.f32 %v2983_v35, %v316_v21  ;;  %v319_v33 = vadd.f32 %v2847_v8, %v207_v37  ;;  %v320_v10 = vadd.f32 %v2847_v8, %v208_v9  ;;  %v1051_v25 = vadd.f32 %v1019_v0, %v2847_v8 }
  0xc5   :  { %v471_v26 = vadd.f32 %v2987_v15, %v325_v58  ;;  %v1052_v43 = vadd.f32 %v1020_v6, %v2847_v8  ;;  %v1053_v18 = vadd.f32 %v2831_v27, %v283_v24  ;;  %v1054_v54 = vadd.f32 %v2835_v44, %v283_v24  ;;  %v4280_v6 = vld [vmem:[#allocation15_spill] sm:$0xff] }
  0xc6   :  { %v1133_v28 = vadd.f32 %v2868_v3, %v1051_v25  ;;  %v321_v35 = vadd.f32 %v283_v24, %v3053_v17  ;;  %v322_v55 = vadd.f32 %v283_v24, %v3057_v62  ;;  %v616_v56 = vadd.f32 %v3009_v45, %v470_v31  ;;  %v4281_v24 = vld [vmem:[#allocation10_spill] sm:$0xff] }
  0xc7   :  { %2269 = vset.pattern.permute.xlu1 %v4224_v61  ;;  %v3185_v14 = vadd.f32 %v2872_v13, %v1052_v43  ;;  %v1135_v8 = vadd.f32 %v2705_v59, %v1053_v18  ;;  %v3189_v27 = vadd.f32 %v2709_v60, %v1054_v54  ;;  %v142_v44 = vpop.permute.xlu0 %141  ;;  %v618_v3 = vadd.f32 %v3084_v29, %v472_v16  ;;  %v4276_v59 = vld [vmem:[#allocation9_spill] sm:$0xff]  ;;  %v515_v21 = vpop.permute.xlu1 %514  ;;  %v4283_v43 = vld [vmem:[#allocation42_spill] sm:$0xff]  ;;  %v4284_v54 = vld [vmem:[#allocation43_spill] sm:$0xff] }
  0xc8   :  { %482 = vperm.xlu1 %2269, %v2659_v47   ;;  %v465_v15 = vadd.f32 %v3072_v7, %v319_v33  ;;  %v466_v62 = vadd.f32 %v3076_v4, %v320_v10  ;;  %v3196_v17 = vadd.f32 %v2904_v49, %v1133_v28  ;;  %v1099_v45 = vmul.f32 %v2684_v52, %v373_v19  ;;  %v4282_v10 = vld [vmem:[#allocation41_spill] sm:$0xff] }
  0xc9   :  { %4272 = vst [vmem:[#allocation77_spill] sm:$0xff] %v3185_v14  ;;  %4273 = vst [vmem:[#allocation78_spill] sm:$0xff] %v3189_v27  ;;  %v3200_v13 = vadd.f32 %v2946_v30, %v1135_v8  ;;  %v1100_v60 = vmul.f32 %v4276_v59, %v373_v19  ;;  %v205_v39 = vmul.f32 %v2940_v22, %v142_v44  ;;  %v4277_v30 = vld [vmem:[#allocation59_spill] sm:$0xff]  ;;  %v4279_v9 = vmov 3  }
  0xca   :  { %4274 = vst [vmem:[#allocation79_spill] sm:$0xff] %v3196_v17  ;;  %v206_v42 = vmul.f32 %v2943_v12, %v142_v44  ;;  %v3206_v29 = vadd.f32 %v2971_v34, %v321_v35  ;;  %v468_v7 = vadd.f32 %v2975_v40, %v322_v55  ;;  %v1017_v4 = vmul.f32 %v2814_v51, %v142_v44 }
  0xcb   :  { %4275 = vst [vmem:[#allocation80_spill] sm:$0xff] %v3200_v13  ;;  %v1018_v49 = vmul.f32 %v2571_v32, %v142_v44  ;;  %v317_v63 = vadd.f32 %v273_v23, %v205_v39  ;;  %v762_v58 = vadd.f32 %v4277_v30, %v616_v56  ;;  %v764_v37 = vadd.f32 %v4278_v11, %v618_v3  ;;  %v3217_v40 = vpop.permute.xlu0 %126 }
  0xcc   :  { %v318_v31 = vadd.f32 %v273_v23, %v206_v42  ;;  %2271 = vset.pattern.permute.xlu1 %v4279_v9  ;;  %v1049_v0 = vadd.f32 %v1017_v4, %v273_v23  ;;  %v1179_v34 = vmul.f32 %v4280_v6, %v515_v21  ;;  %v1180_v33 = vmul.f32 %v4281_v24, %v515_v21  ;;  %v4288_v42 = vld [vmem:[#allocation68_spill] sm:$0xff] }
  0xcd   :  { %v1050_v16 = vadd.f32 %v1018_v49, %v273_v23  ;;  %628 = vperm.xlu1 %2271, %v2659_v47   ;;  %v431_v25 = vmul.f32 %v4282_v10, %v373_v19  ;;  %v432_v18 = vmul.f32 %v4283_v43, %v373_v19  ;;  %v575_v28 = vmul.f32 %v4284_v54, %v515_v21  ;;  %v4287_v47 = vld [vmem:[#allocation55_spill] sm:$0xff]  ;;  %v661_v49 = vpop.permute.xlu1 %660 }
  0xce   :  { %v576_v35 = vmul.f32 %v2929_v36, %v515_v21  ;;  %v1131_v55 = vadd.f32 %v1099_v45, %v1049_v0  ;;  %v1211_v23 = vadd.f32 %v1179_v34, %v3147_v41  ;;  %v3226_v8 = vadd.f32 %v1180_v33, %v1130_v20  ;;  %v4289_v21 = vld [vmem:[#allocation19_spill] sm:$0xff]  ;;  %v4292_v20 = vld [vmem:[#allocation58_spill] sm:$0xff] }
  0xcf   :  { %v3223_v56 = vadd.f32 %v1100_v60, %v1050_v16  ;;  %v794_v44 = vmax.f32 %v762_v58, 0.0  ;;  %v796_v3 = vmax.f32 %v764_v37, 0.0  ;;  %v615_v39 = vadd.f32 %v4287_v47, %v3144_v46  ;;  %v4290_v60 = vld [vmem:[#allocation11_spill] sm:$0xff]  ;;  %v4293_v37 = vld [vmem:[#allocation62_spill] sm:$0xff] }
  0xd0   :  { %4286 = vst [vmem:[#allocation59_spill] sm:$0xff] %v3226_v8  ;;  %v617_v4 = vadd.f32 %v4288_v42, %v471_v26  ;;  %v3231_v19 = vadd.f32 %v431_v25, %v317_v63  ;;  %v3233_v30 = vadd.f32 %v432_v18, %v318_v31  ;;  %v1261_v45 = vmul.f32 %v4289_v21, %v661_v49  ;;  %v4294_v46 = vld [vmem:[#allocation70_spill] sm:$0xff]  ;;  %v4296_v33 = vld [vmem:[#allocation39_spill] sm:$0xff]  ;;  %v3250_v18 = vpop.permute.xlu0 %262 }
  0xd1   :  { %4285 = vst [vmem:[#allocation9_spill] sm:$0xff] %v3223_v56  ;;  %v3237_v11 = vmul.f32 %v4290_v60, %v661_v49  ;;  %632 = vperm.xlu1 %2271, %v2606_v38   ;;  %v812_v41 = vpack.c.bf16 %v796_v3, %v794_v44  ;;  %v761_v58 = vadd.f32 %v4292_v20, %v615_v39  ;;  %v4295_v31 = vld [vmem:[#allocation74_spill] sm:$0xff]  ;;  %v665_v20 = vpop.permute.xlu1 %664 }
  0xd2   :  { %v763_v0 = vadd.f32 %v4293_v37, %v617_v4  ;;  %v612_v16 = vadd.f32 %v4294_v46, %v466_v62  ;;  %v3244_v26 = vadd.f32 %v575_v28, %v3166_v2  ;;  %v3246_v63 = vadd.f32 %v1261_v45, %v1211_v23  ;;  %v4297_v62 = vld [vmem:[#allocation65_spill] sm:$0xff]  ;;  %v4300_v37 = vld [vmem:[#allocation44_spill] sm:$0xff] }
  0xd3   :  { %4291 = vst [vmem:[#allocation63_spill] sm:$0xff] %v3237_v11  ;;  %v614_v34 = vadd.f32 %v4295_v31, %v468_v7  ;;  %v1213_v25 = vadd.f32 %v4296_v33, %v1131_v55  ;;  %933 = vmatprep.subr.bf16.mxu1 %v812_v41  ;;  %v793_v38 = vmax.f32 %v761_v58, 0.0  ;;  %v842_v42 = vunpack.c.l.bf16 %v812_v41  ;;  %v4298_v23 = vld [vmem:[#allocation69_spill] sm:$0xff]  ;;  %v4301_v31 = vld [vmem:[#allocation14_spill] sm:$0xff] }
  0xd4   :  { %v795_v47 = vmax.f32 %v763_v0, 0.0  ;;  %v844_v39 = vunpack.c.h.bf16 %v812_v41  ;;  %v3253_v4 = vadd.f32 %v576_v35, %v3170_v1  ;;  %v758_v2 = vadd.f32 %v4297_v62, %v612_v16  ;;  %v4303_v62 = vld [vmem:[#allocation73_spill] sm:$0xff] }
  0xd5   :  { %v760_v28 = vadd.f32 %v3134_v50, %v614_v34  ;;  %v611_v45 = vadd.f32 %v4298_v23, %v465_v15  ;;  %v4299_v7 = vmov 0   ;;  %v3260_v46 = vmul.f32 %v4300_v37, %v661_v49  ;;  %v3267_v50 = vpop.permute.xlu0 %121 }
  0xd6   :  { %2272 = vset.pattern.permute.xlu1 %v4299_v7  ;;  %v811_v55 = vpack.c.bf16 %v795_v47, %v793_v38  ;;  %v874_v58 = vsub.f32 %v794_v44, %v842_v42  ;;  %v876_v0 = vsub.f32 %v796_v3, %v844_v39  ;;  %v790_v41 = vmax.f32 %v758_v2, 0.0  ;;  %v67_v44 = vld [vmem:[%s4096_s2] sm:$0xff] }
  0xd7   :  { %91 = vperm.xlu1 %2272, %v4301_v31   ;;  %v792_v33 = vmax.f32 %v760_v28, 0.0  ;;  %v1263_v1 = vmul.f32 %v4289_v21, %v665_v20  ;;  %v3265_v35 = vmul.f32 %v4290_v60, %v665_v20  ;;  %v613_v23 = vadd.f32 %v4303_v62, %v3206_v29  ;;  %v4304_v3 = vld [vmem:[#allocation45_spill] sm:$0xff]  ;;  %v4305_v28 = vld [vmem:[#allocation64_spill] sm:$0xff] }
  0xd8   :  { %934 = vmatpush1.bf16.xpose.msra.mxu1 %v811_v55  ;;  %v892_v15 = vpack.c.bf16 %v876_v0, %v874_v58  ;;  %v841_v16 = vunpack.c.l.bf16 %v811_v55  ;;  %v843_v34 = vunpack.c.h.bf16 %v811_v55  ;;  %v722_v42 = vmul.f32 %v4304_v3, %v661_v49  ;;  %v4306_v0 = vld [vmem:[#allocation75_spill] sm:$0xff] }
  0xd9   :  { %4302 = vst [vmem:[#allocation15_spill] sm:$0xff] %v3265_v35  ;;  %v810_v39 = vpack.c.bf16 %v792_v33, %v790_v41  ;;  %v3275_v2 = vadd.f32 %v1263_v1, %v1213_v25  ;;  %v757_v7 = vadd.f32 %v4305_v28, %v611_v45  ;;  %v132_v35 = vpop.permute.xlu1 %131  ;;  %v759_v55 = vadd.f32 %v4306_v0, %v613_v23  ;;  %v3283_v25 = vpop.permute.xlu0 %106 }
  0xda   :  { %893 = vmatprep.subr.bf16.mxu0 %v892_v15  ;;  %v873_v11 = vsub.f32 %v793_v38, %v841_v16  ;;  %v875_v58 = vsub.f32 %v795_v47, %v843_v34  ;;  %v199_v29 = vmul.f32 %v2940_v22, %v3217_v40  ;;  %v200_v49 = vmul.f32 %v2943_v12, %v3217_v40 }
  0xdb   :  { %935 = vmatprep.subr.bf16.mxu1 %v810_v39  ;;  %v789_v62 = vmax.f32 %v757_v7, 0.0  ;;  %v838_v8 = vunpack.c.l.bf16 %v810_v39  ;;  %v840_v56 = vunpack.c.h.bf16 %v810_v39  ;;  %217 = vperm.xlu1 %2272, %v67_v44   ;;  %v791_v1 = vmax.f32 %v759_v55, 0.0 }
  0xdc   :  { %v891_v45 = vpack.c.bf16 %v875_v58, %v873_v11  ;;  %v1011_v38 = vmul.f32 %v2814_v51, %v3217_v40  ;;  %v1012_v47 = vmul.f32 %v2571_v32, %v3217_v40  ;;  %v201_v34 = vmul.f32 %v2940_v22, %v132_v35 }
  0xdd   :  { %v870_v15 = vsub.f32 %v790_v41, %v838_v8  ;;  %v872_v16 = vsub.f32 %v792_v33, %v840_v56  ;;  %v202_v23 = vmul.f32 %v2943_v12, %v132_v35  ;;  %v258_v39 = vpop.permute.xlu1 %257  ;;  %v723_v44 = vmul.f32 %v4300_v37, %v665_v20 }
  0xde   :  { %894 = vmatpush1.bf16.xpose.msra.mxu0 %v891_v45  ;;  %v809_v28 = vpack.c.bf16 %v791_v1, %v789_v62  ;;  %v1013_v11 = vmul.f32 %v2814_v51, %v132_v35  ;;  %v1014_v7 = vmul.f32 %v2571_v32, %v132_v35  ;;  %v724_v58 = vmul.f32 %v4304_v3, %v665_v20  ;;  %v4307_v45 = vld [vmem:[#allocation13_spill] sm:$0xff] }
  0xdf   :  { %v890_v0 = vpack.c.bf16 %v872_v16, %v870_v15  ;;  %v313_v40 = vadd.f32 %v3250_v18, %v201_v34  ;;  %v311_v8 = vadd.f32 %v258_v39, %v199_v29  ;;  %2274 = vset.pattern.permute.xlu1 %v4271_v5  ;;  %v314_v35 = vadd.f32 %v3250_v18, %v202_v23  ;;  %v3301_v16 = vpop.permute.xlu0 %242  ;;  %v4308_v5 = vld [vmem:[#allocation16_spill] sm:$0xff] }
  0xe0   :  { %936 = vmatpush1.bf16.xpose.msra.mxu1 %v809_v28  ;;  %v837_v56 = vunpack.c.l.bf16 %v809_v28  ;;  %v839_v41 = vunpack.c.h.bf16 %v809_v28  ;;  %v1045_v33 = vadd.f32 %v1013_v11, %v3250_v18  ;;  %v1046_v55 = vadd.f32 %v1014_v7, %v3250_v18  ;;  %328 = vperm.xlu1 %2274, %v4307_v45   ;;  %v4309_v28 = vld [vmem:[#allocation17_spill] sm:$0xff]  ;;  %v4310_v7 = vld [vmem:[#allocation72_spill] sm:$0xff]  ;;  %v4311_v18 = vld [vmem:[#allocation71_spill] sm:$0xff] }
  0xe1   :  { %895 = vmatprep.subr.bf16.mxu0 %v890_v0  ;;  %v312_v13 = vadd.f32 %v258_v39, %v200_v49  ;;  %v1043_v20 = vadd.f32 %v1011_v38, %v258_v39  ;;  %v1044_v15 = vadd.f32 %v1012_v47, %v258_v39  ;;  %v361_v11 = vpop.permute.xlu1 %360  ;;  %v610_v14 = vadd.f32 %v4310_v7, %v3233_v30  ;;  %v4312_v39 = vld [vmem:[#allocation52_spill] sm:$0xff]  ;;  %v4313_v30 = vld [vmem:[#allocation53_spill] sm:$0xff] }
  0xe2   :  { %v869_v29 = vsub.f32 %v789_v62, %v837_v56  ;;  %v871_v34 = vsub.f32 %v791_v1, %v839_v41  ;;  %v3304_v17 = vadd.f32 %v4308_v5, %v1045_v33  ;;  %v3307_v27 = vadd.f32 %v4309_v28, %v1046_v55 }
  0xe3   :  { %v754_v0 = vadd.f32 %v722_v42, %v3253_v4  ;;  %v609_v49 = vadd.f32 %v4311_v18, %v3231_v19  ;;  %v753_v38 = vadd.f32 %v3260_v46, %v3244_v26  ;;  %v425_v1 = vmul.f32 %v4282_v10, %v361_v11  ;;  %v3323_v19 = vpop.permute.xlu0 %101 }
  0xe4   :  { %v889_v62 = vpack.c.bf16 %v871_v34, %v869_v29  ;;  %v426_v47 = vmul.f32 %v4283_v43, %v361_v11  ;;  %v1093_v23 = vmul.f32 %v2684_v52, %v361_v11  ;;  %2275 = vset.pattern.permute.xlu1 %v4224_v61  ;;  %v459_v56 = vadd.f32 %v4312_v39, %v313_v40 }
  0xe5   :  { %v460_v41 = vadd.f32 %v4313_v30, %v314_v35  ;;  %v756_v4 = vadd.f32 %v724_v58, %v610_v14  ;;  %v755_v42 = vadd.f32 %v723_v44, %v609_v49  ;;  %474 = vperm.xlu1 %2275, %v4307_v45   ;;  %4314 = vst [vmem:[#allocation10_spill] sm:$0xff] %v3323_v19  ;;  %v786_v26 = vmax.f32 %v754_v0, 0.0  ;;  %v507_v28 = vpop.permute.xlu1 %506 }
  0xe6   :  { %896 = vmatpush1.bf16.xpose.msra.mxu0 %v889_v62  ;;  %v785_v46 = vmax.f32 %v753_v38, 0.0  ;;  %v1094_v33 = vmul.f32 %v4276_v59, %v361_v11  ;;  %v1125_v55 = vadd.f32 %v1093_v23, %v1043_v20  ;;  %v457_v5 = vadd.f32 %v425_v1, %v311_v8  ;;  %v4316_v23 = vld [vmem:[#allocation32_spill] sm:$0xff] }
  0xe7   :  { %v788_v29 = vmax.f32 %v756_v4, 0.0  ;;  %v787_v34 = vmax.f32 %v755_v42, 0.0  ;;  %v458_v61 = vadd.f32 %v426_v47, %v312_v13  ;;  %v571_v35 = vmul.f32 %v4284_v54, %v507_v28  ;;  %v3339_v1 = vpop.permute.xlu0 %86 }
  0xe8   :  { %v1126_v40 = vadd.f32 %v1094_v33, %v1044_v15  ;;  %v572_v14 = vmul.f32 %v2929_v36, %v507_v28  ;;  %v1175_v44 = vmul.f32 %v4280_v6, %v507_v28  ;;  %v1176_v7 = vmul.f32 %v4281_v24, %v507_v28  ;;  %4315 = vst [vmem:[#allocation41_spill] sm:$0xff] %v3339_v1 }
  0xe9   :  { %v808_v58 = vpack.c.bf16 %v788_v29, %v786_v26  ;;  %v807_v45 = vpack.c.bf16 %v787_v34, %v785_v46  ;;  %478 = vperm.xlu1 %2275, %v4301_v31   ;;  %v3333_v20 = vmul.f32 %v2814_v51, %v3267_v50  ;;  %v603_v8 = vadd.f32 %v571_v35, %v457_v5  ;;  %v511_v62 = vpop.permute.xlu1 %510 }
  0xea   :  { %v604_v13 = vadd.f32 %v572_v14, %v458_v61  ;;  %v1207_v11 = vadd.f32 %v1175_v44, %v1125_v55  ;;  %v3337_v15 = vmul.f32 %v2571_v32, %v3267_v50  ;;  %v3341_v47 = vadd.f32 %v1176_v7, %v1126_v40 }
  0xeb   :  { %937 = vmatprep.subr.bf16.mxu1 %v808_v58  ;;  %v834_v0 = vunpack.c.l.bf16 %v808_v58  ;;  %v836_v18 = vunpack.c.h.bf16 %v808_v58  ;;  %v833_v49 = vunpack.c.l.bf16 %v807_v45  ;;  %v835_v38 = vunpack.c.h.bf16 %v807_v45 }
  0xec   :  { %938 = vmatpush1.bf16.xpose.msra.mxu1 %v807_v45  ;;  %v3344_v39 = vadd.f32 %v4316_v23, %v1207_v11  ;;  %v573_v30 = vmul.f32 %v4284_v54, %v511_v62  ;;  %v574_v4 = vmul.f32 %v2929_v36, %v511_v62  ;;  %v1177_v61 = vmul.f32 %v4280_v6, %v511_v62 }
  0xed   :  { %v866_v42 = vsub.f32 %v786_v26, %v834_v0  ;;  %v868_v33 = vsub.f32 %v788_v29, %v836_v18  ;;  %v865_v55 = vsub.f32 %v785_v46, %v833_v49  ;;  %v867_v5 = vsub.f32 %v787_v34, %v835_v38  ;;  %2277 = vset.pattern.permute.xlu1 %v4279_v9  ;;  %v657_v26 = vpop.permute.xlu1 %656  ;;  %v4317_v46 = vld [vmem:[#allocation67_spill] sm:$0xff]  ;;  %v4318_v34 = vld [vmem:[#allocation66_spill] sm:$0xff]  ;;  %v4322_v18 = vld [vmem:[#allocation25_spill] sm:$0xff] }
  0xee   :  { %v1178_v28 = vmul.f32 %v4281_v24, %v511_v62  ;;  %624 = vperm.xlu1 %2277, %v4301_v31   ;;  %v605_v14 = vadd.f32 %v573_v30, %v459_v56  ;;  %v606_v44 = vadd.f32 %v574_v4, %v460_v41  ;;  %v1209_v58 = vadd.f32 %v1177_v61, %v3304_v17  ;;  %v3364_v41 = vpop.permute.xlu0 %222  ;;  %v4321_v17 = vld [vmem:[#allocation20_spill] sm:$0xff]  ;;  %v4325_v4 = vld [vmem:[#allocation34_spill] sm:$0xff] }
  0xef   :  { %v888_v40 = vpack.c.bf16 %v868_v33, %v866_v42  ;;  %v887_v35 = vpack.c.bf16 %v867_v5, %v865_v55  ;;  %v750_v29 = vadd.f32 %v4317_v46, %v604_v13  ;;  %v749_v9 = vadd.f32 %v4318_v34, %v603_v8  ;;  %4320 = vst [vmem:[#allocation43_spill] sm:$0xff] %v3364_v41 }
  0xf0   :  { %v3354_v45 = vadd.f32 %v1178_v28, %v3307_v27  ;;  %v719_v7 = vmul.f32 %v4300_v37, %v657_v26  ;;  %v720_v11 = vmul.f32 %v4304_v3, %v657_v26  ;;  %v1259_v31 = vmul.f32 %v4289_v21, %v657_v26 }
  0xf1   :  { %897 = vmatprep.subr.bf16.mxu0 %v888_v40  ;;  %v3362_v56 = vmul.f32 %v4290_v60, %v657_v26  ;;  %v421_v27 = vmul.f32 %v4282_v10, %v4321_v17  ;;  %v3370_v13 = vmul.f32 %v4283_v43, %v4321_v17  ;;  %v3374_v8 = vmul.f32 %v2814_v51, %v3283_v25  ;;  %v117_v5 = vpop.permute.xlu1 %116 }
  0xf2   :  { %898 = vmatpush1.bf16.xpose.msra.mxu0 %v887_v35  ;;  %v3378_v0 = vmul.f32 %v2571_v32, %v3283_v25  ;;  %v3382_v49 = vmul.f32 %v4282_v10, %v4322_v18  ;;  %v3384_v38 = vadd.f32 %v1259_v31, %v1209_v58  ;;  %v752_v62 = vadd.f32 %v720_v11, %v606_v44  ;;  %v4331_v58 = vld [vmem:[#allocation46_spill] sm:$0xff] }
  0xf3   :  { %4319 = vst [vmem:[#allocation42_spill] sm:$0xff] %v3362_v56  ;;  %v751_v23 = vadd.f32 %v719_v7, %v605_v14  ;;  %v3388_v30 = vmul.f32 %v4283_v43, %v4322_v18  ;;  %v3392_v42 = vmul.f32 %v4300_v37, %v4325_v4  ;;  %v3396_v33 = vmul.f32 %v2814_v51, %v3323_v19  ;;  %v3402_v14 = vpop.permute.xlu0 %336 }
  0xf4   :  { %4323 = vst [vmem:[#allocation55_spill] sm:$0xff] %v3382_v49  ;;  %v3400_v55 = vmul.f32 %v2571_v32, %v3323_v19  ;;  %v782_v61 = vmax.f32 %v750_v29, 0.0  ;;  %v784_v28 = vmax.f32 %v752_v62, 0.0  ;;  %v781_v40 = vmax.f32 %v749_v9, 0.0  ;;  %4329 = vst [vmem:[#allocation62_spill] sm:$0xff] %v3402_v14 }
  0xf5   :  { %4324 = vst [vmem:[#allocation68_spill] sm:$0xff] %v3388_v30  ;;  %4326 = vst [vmem:[#allocation19_spill] sm:$0xff] %v3392_v42  ;;  %v783_v35 = vmax.f32 %v751_v23, 0.0  ;;  %v3406_v44 = vmul.f32 %v4304_v3, %v4325_v4  ;;  %v3410_v26 = vmul.f32 %v4284_v54, %v4331_v58  ;;  %v1007_v46 = vmul.f32 %v2814_v51, %v117_v5  ;;  %v248_v23 = vpop.permute.xlu1 %247  ;;  %v4337_v30 = vld [vmem:[#allocation21_spill] sm:$0xff] }
  0xf6   :  { %4327 = vst [vmem:[#allocation11_spill] sm:$0xff] %v3396_v33  ;;  %4328 = vst [vmem:[#allocation58_spill] sm:$0xff] %v3400_v55  ;;  %v1008_v34 = vmul.f32 %v2571_v32, %v117_v5  ;;  %v806_v7 = vpack.c.bf16 %v784_v28, %v782_v61  ;;  %v3416_v29 = vmul.f32 %v2814_v51, %v3339_v1 }
  0xf7   :  { %4330 = vst [vmem:[#allocation70_spill] sm:$0xff] %v3406_v44  ;;  %v805_v11 = vpack.c.bf16 %v783_v35, %v781_v40  ;;  %v3420_v9 = vmul.f32 %v2571_v32, %v3339_v1  ;;  %v3424_v31 = vmul.f32 %v2929_v36, %v4331_v58  ;;  %v195_v17 = vmul.f32 %v2940_v22, %v117_v5  ;;  %v3435_v41 = vpop.permute.xlu0 %332 }
  0xf8   :  { %4332 = vst [vmem:[#allocation74_spill] sm:$0xff] %v3416_v29  ;;  %v3429_v18 = vmul.f32 %v2684_v52, %v3402_v14  ;;  %v3433_v62 = vmul.f32 %v4276_v59, %v3402_v14  ;;  %939 = vmatprep.subr.bf16.mxu1 %v806_v7  ;;  %v830_v4 = vunpack.c.l.bf16 %v806_v7  ;;  %v832_v29 = vunpack.c.h.bf16 %v806_v7  ;;  %4336 = vst [vmem:[#allocation44_spill] sm:$0xff] %v3435_v41  ;;  %v4338_v7 = vld [vmem:[#allocation22_spill] sm:$0xff] }
  0xf9   :  { %4333 = vst [vmem:[#allocation39_spill] sm:$0xff] %v3420_v9  ;;  %v829_v1 = vunpack.c.l.bf16 %v805_v11  ;;  %v831_v9 = vunpack.c.h.bf16 %v805_v11  ;;  %v307_v58 = vadd.f32 %v248_v23, %v195_v17  ;;  %v1039_v19 = vadd.f32 %v1007_v46, %v248_v23  ;;  %940 = vmatpush1.bf16.xpose.msra.mxu1 %v805_v11  ;;  %v253_v17 = vpop.permute.xlu1 %252 }
  0xfa   :  { %4334 = vst [vmem:[#allocation65_spill] sm:$0xff] %v3429_v18  ;;  %4335 = vst [vmem:[#allocation69_spill] sm:$0xff] %v3433_v62  ;;  %v1040_v55 = vadd.f32 %v1008_v34, %v248_v23  ;;  %v197_v33 = vmul.f32 %v2940_v22, %v3267_v50  ;;  %v862_v18 = vsub.f32 %v782_v61, %v830_v4  ;;  %v4347_v4 = vld [vmem:[#allocation77_spill] sm:$0xff] }
  0xfb   :  { %v864_v42 = vsub.f32 %v784_v28, %v832_v29  ;;  %v861_v44 = vsub.f32 %v781_v40, %v829_v1  ;;  %v863_v14 = vsub.f32 %v783_v35, %v831_v9  ;;  %v3441_v49 = vadd.f32 %v4337_v30, %v1039_v19  ;;  %v3450_v1 = vpop.permute.xlu0 %620 }
  0xfc   :  { %v3444_v56 = vadd.f32 %v4338_v7, %v1040_v55  ;;  %v198_v46 = vmul.f32 %v2943_v12, %v3267_v50  ;;  %v196_v11 = vmul.f32 %v2943_v12, %v117_v5  ;;  %4339 = vst [vmem:[#allocation14_spill] sm:$0xff] %v3450_v1  ;;  %v1041_v40 = vadd.f32 %v3333_v20, %v253_v17 }
  0xfd   :  { %v886_v61 = vpack.c.bf16 %v864_v42, %v862_v18  ;;  %v885_v28 = vpack.c.bf16 %v863_v14, %v861_v44  ;;  %v1042_v19 = vadd.f32 %v3337_v15, %v253_v17  ;;  %v3456_v30 = vmul.f32 %v2940_v22, %v3283_v25  ;;  %v4342_v15 = vld [vmem:[#allocation76_spill] sm:$0xff]  ;;  %v4343_v44 = vld [vmem:[#allocation18_spill] sm:$0xff] }
  0xfe   :  { %v3460_v50 = vmul.f32 %v2943_v12, %v3283_v25  ;;  %v308_v55 = vadd.f32 %v248_v23, %v196_v11  ;;  %v453_v35 = vadd.f32 %v421_v27, %v307_v58  ;;  %v309_v5 = vadd.f32 %v253_v17, %v197_v33  ;;  %v4344_v25 = vld [vmem:[#allocation37_spill] sm:$0xff]  ;;  %v4345_v27 = vld [vmem:[#allocation23_spill] sm:$0xff]  ;;  %v4346_v18 = vld [vmem:[#allocation28_spill] sm:$0xff]  ;;  %v357_v11 = vpop.permute.xlu1 %356 }
  0xff   :  { %899 = vmatprep.subr.bf16.mxu0 %v886_v61  ;;  %v3464_v42 = vmul.f32 %v2684_v52, %v3435_v41  ;;  %v310_v14 = vadd.f32 %v253_v17, %v198_v46  ;;  %v3468_v20 = vmul.f32 %v4289_v21, %v3450_v1  ;;  %v1220_v29 = vadd.f32 %v4343_v44, %v4342_v15  ;;  %v4348_v58 = vld [vmem:[#allocation38_spill] sm:$0xff]  ;;  %v4349_v17 = vld [vmem:[#allocation24_spill] sm:$0xff]  ;;  %v4352_v44 = vld [vmem:[#allocation49_spill] sm:$0xff] }
 0x100   :  { %900 = vmatpush1.bf16.xpose.msra.mxu0 %v885_v28  ;;  %v1222_v9 = vadd.f32 %v4344_v25, %v3153_v48  ;;  %v1301_v33 = vadd.f32 %v4345_v27, %v3137_v53  ;;  %v1303_v23 = vadd.f32 %v4346_v18, %v3163_v57  ;;  %v1216_v7 = vadd.f32 %v4348_v58, %v4347_v4  ;;  %v4350_v28 = vld [vmem:[#allocation29_spill] sm:$0xff]  ;;  %v4351_v48 = vld [vmem:[#allocation78_spill] sm:$0xff] }
 0x101   :  { %4340 = vst [vmem:[#allocation73_spill] sm:$0xff] %v3464_v42  ;;  %4341 = vst [vmem:[#allocation45_spill] sm:$0xff] %v3468_v20  ;;  %v1302_v61 = vadd.f32 %v4349_v17, %v1220_v29  ;;  %v4163_v15 = vmov 1065369472   ;;  %v1218_v25 = vadd.f32 %v4352_v44, %v4351_v48  ;;  %v423_v53 = vmul.f32 %v4282_v10, %v357_v11  ;;  %v4356_v1 = vld [vmem:[#allocation61_spill] sm:$0xff] }
 0x102   :  { %v1304_v34 = vadd.f32 %v4350_v28, %v1222_v9  ;;  %965 = vmatprep.mubr.bf16.mxu1 %v4163_v15  ;;  %925 = vmatprep.mubr.bf16.mxu0 %v4163_v15  ;;  %v424_v57 = vmul.f32 %v4283_v43, %v357_v11  ;;  %v1091_v27 = vmul.f32 %v2684_v52, %v357_v11  ;;  %v1333_v58 = vmax.f32 %v1301_v33, 0.0  ;;  %v4355_v15 = vld [vmem:[#allocation31_spill] sm:$0xff] }
 0x103   :  { %v1092_v18 = vmul.f32 %v4276_v59, %v357_v11  ;;  %v1334_v4 = vmax.f32 %v1302_v61, 0.0  ;;  %v1335_v9 = vmax.f32 %v1303_v23, 0.0  ;;  %v455_v17 = vadd.f32 %v423_v53, %v309_v5  ;;  %v499_v11 = vpop.permute.xlu1 %498  ;;  %v4357_v61 = vld [vmem:[#allocation50_spill] sm:$0xff]  ;;  %v4358_v5 = vld [vmem:[#allocation79_spill] sm:$0xff] }
 0x104   :  { %v1336_v29 = vmax.f32 %v1304_v34, 0.0  ;;  %v456_v28 = vadd.f32 %v424_v57, %v310_v14  ;;  %v1123_v46 = vadd.f32 %v1091_v27, %v1041_v40  ;;  %v1298_v20 = vadd.f32 %v4355_v15, %v1216_v7  ;;  %v4359_v14 = vld [vmem:[#allocation30_spill] sm:$0xff] }
 0x105   :  { %v3491_v62 = vadd.f32 %v1092_v18, %v1042_v19  ;;  %v3495_v44 = vpack.c.bf16 %v1335_v9, %v1333_v58  ;;  %v1300_v42 = vadd.f32 %v4356_v1, %v1218_v25  ;;  %v454_v41 = vadd.f32 %v3370_v13, %v308_v55 }
 0x106   :  { %v3493_v48 = vpack.c.bf16 %v1336_v29, %v1334_v4  ;;  %v1205_v34 = vadd.f32 %v4357_v61, %v1123_v46  ;;  %v602_v33 = vadd.f32 %v3424_v31, %v456_v28  ;;  %v3504_v40 = vadd.f32 %v4359_v14, %v4358_v5  ;;  %v4366_v14 = vld [vmem:[#allocation40_spill] sm:$0xff] }
 0x107   :  { %4354 = vst [vmem:[#allocation75_spill] sm:$0xff] %v3495_v44  ;;  %v567_v19 = vmul.f32 %v4284_v54, %v499_v11  ;;  %v568_v23 = vmul.f32 %v2929_v36, %v499_v11  ;;  %v1171_v53 = vmul.f32 %v4280_v6, %v499_v11  ;;  %v1172_v7 = vmul.f32 %v4281_v24, %v499_v11 }
 0x108   :  { %4353 = vst [vmem:[#allocation64_spill] sm:$0xff] %v3493_v48  ;;  %v1382_v1 = vunpack.c.l.bf16 %v3493_v48  ;;  %v1384_v13 = vunpack.c.h.bf16 %v3493_v48  ;;  %v1330_v55 = vmax.f32 %v1298_v20, 0.0  ;;  %v1332_v46 = vmax.f32 %v1300_v42, 0.0  ;;  %v645_v5 = vpop.permute.xlu1 %644  ;;  %v4364_v20 = vld [vmem:[#allocation60_spill] sm:$0xff] }
 0x109   :  { %v599_v15 = vadd.f32 %v567_v19, %v453_v35  ;;  %v1203_v31 = vadd.f32 %v1171_v53, %v3441_v49  ;;  %v3514_v25 = vadd.f32 %v1172_v7, %v3444_v56  ;;  %v601_v57 = vadd.f32 %v3410_v26, %v455_v17  ;;  %v4363_v35 = vld [vmem:[#allocation80_spill] sm:$0xff]  ;;  %v4365_v56 = vld [vmem:[#allocation9_spill] sm:$0xff] }
 0x10a   :  { %v3517_v27 = vsub.f32 %v1334_v4, %v1382_v1  ;;  %v3519_v18 = vsub.f32 %v1336_v29, %v1384_v13  ;;  %v3521_v28 = vpack.c.bf16 %v1332_v46, %v1330_v55  ;;  %v1381_v11 = vunpack.c.l.bf16 %v3495_v44 }
 0x10b   :  { %v600_v61 = vadd.f32 %v568_v23, %v454_v41  ;;  %v1383_v42 = vunpack.c.h.bf16 %v3495_v44  ;;  %v3527_v49 = vadd.f32 %v4364_v20, %v4363_v35  ;;  %v1214_v19 = vadd.f32 %v4366_v14, %v4365_v56 }
 0x10c   :  { %4360 = vst [vmem:[#allocation13_spill] sm:$0xff] %v3517_v27  ;;  %4361 = vst [vmem:[#allocation16_spill] sm:$0xff] %v3519_v18  ;;  %v713_v26 = vmul.f32 %v4300_v37, %v645_v5  ;;  %v714_v4 = vmul.f32 %v4304_v3, %v645_v5  ;;  %v1253_v29 = vmul.f32 %v4289_v21, %v645_v5  ;;  %v1378_v7 = vunpack.c.l.bf16 %v3521_v28  ;;  %v649_v56 = vpop.permute.xlu1 %648  ;;  %v4377_v27 = vld [vmem:[#allocation26_spill] sm:$0xff] }
 0x10d   :  { %4362 = vst [vmem:[#allocation17_spill] sm:$0xff] %v3521_v28  ;;  %v3535_v17 = vmul.f32 %v4290_v60, %v645_v5  ;;  %v3539_v23 = vsub.f32 %v1333_v58, %v1381_v11  ;;  %v3541_v53 = vsub.f32 %v1335_v9, %v1383_v42  ;;  %v1380_v35 = vunpack.c.h.bf16 %v3521_v28  ;;  %v4370_v11 = vld [vmem:[#allocation59_spill] sm:$0xff] }
 0x10e   :  { %v3544_v1 = vadd.f32 %v1253_v29, %v1203_v31  ;;  %v746_v13 = vadd.f32 %v714_v4, %v600_v61  ;;  %v1329_v20 = vmax.f32 %v3504_v40, 0.0  ;;  %v3550_v14 = vsub.f32 %v1330_v55, %v1378_v7  ;;  %v4371_v9 = vld [vmem:[#allocation63_spill] sm:$0xff] }
 0x10f   :  { %4367 = vst [vmem:[#allocation72_spill] sm:$0xff] %v3539_v23  ;;  %4368 = vst [vmem:[#allocation71_spill] sm:$0xff] %v3541_v53  ;;  %v1331_v58 = vmax.f32 %v3527_v49, 0.0  ;;  %v3555_v42 = vadd.f32 %v4371_v9, %v4370_v11  ;;  %v715_v31 = vmul.f32 %v4300_v37, %v649_v56  ;;  %v716_v61 = vmul.f32 %v4304_v3, %v649_v56 }
 0x110   :  { %4369 = vst [vmem:[#allocation52_spill] sm:$0xff] %v3550_v14  ;;  %v1255_v4 = vmul.f32 %v4289_v21, %v649_v56  ;;  %v745_v29 = vadd.f32 %v713_v26, %v599_v15  ;;  %v3562_v41 = vmul.f32 %v4290_v60, %v649_v56  ;;  %v3564_v55 = vsub.f32 %v1332_v46, %v1380_v35  ;;  %v4374_v15 = vld [vmem:[#allocation15_spill] sm:$0xff] }
 0x111   :  { %v748_v11 = vadd.f32 %v716_v61, %v602_v33  ;;  %v747_v9 = vadd.f32 %v715_v31, %v601_v57  ;;  %v3569_v5 = vpack.c.bf16 %v1331_v58, %v1329_v20  ;;  %v778_v23 = vmax.f32 %v746_v13, 0.0  ;;  %v112_v40 = vpop.permute.xlu1 %111 }
 0x112   :  { %4372 = vst [vmem:[#allocation53_spill] sm:$0xff] %v3564_v55  ;;  %v3567_v7 = vadd.f32 %v1255_v4, %v1205_v34  ;;  %v3574_v26 = vadd.f32 %v4374_v15, %v1214_v19  ;;  %v4375_v56 = vmax.f32 %v3246_v63, 0.0  ;;  %v4376_v46 = vmax.f32 %v3275_v2, 0.0 }
 0x113   :  { %4373 = vst [vmem:[#allocation32_spill] sm:$0xff] %v3569_v5  ;;  %v780_v34 = vmax.f32 %v748_v11, 0.0  ;;  %v777_v4 = vmax.f32 %v745_v29, 0.0  ;;  %v779_v33 = vmax.f32 %v747_v9, 0.0  ;;  %v1326_v57 = vmax.f32 %v3555_v42, 0.0 }
 0x114   :  { %v3580_v35 = vpack.c.bf16 %v4376_v46, %v4375_v56  ;;  %v193_v13 = vmul.f32 %v2940_v22, %v112_v40  ;;  %v194_v31 = vmul.f32 %v2943_v12, %v112_v40  ;;  %v1005_v61 = vmul.f32 %v2814_v51, %v112_v40 }
 0x115   :  { %v1006_v19 = vmul.f32 %v2571_v32, %v112_v40  ;;  %v804_v53 = vpack.c.bf16 %v780_v34, %v778_v23  ;;  %v803_v49 = vpack.c.bf16 %v779_v33, %v777_v4  ;;  %v1377_v56 = vunpack.c.l.bf16 %v3569_v5  ;;  %v238_v46 = vpop.permute.xlu1 %237 }
 0x116   :  { %v1037_v11 = vadd.f32 %v1005_v61, %v3301_v16  ;;  %v1328_v42 = vmax.f32 %v3574_v26, 0.0  ;;  %v1379_v9 = vunpack.c.h.bf16 %v3569_v5  ;;  %v305_v15 = vadd.f32 %v3301_v16, %v193_v13  ;;  %v4378_v61 = vld [vmem:[#allocation27_spill] sm:$0xff] }
 0x117   :  { %v1038_v29 = vadd.f32 %v1006_v19, %v3301_v16  ;;  %941 = vmatprep.subr.bf16.mxu1 %v804_v53  ;;  %v826_v14 = vunpack.c.l.bf16 %v804_v53  ;;  %v828_v55 = vunpack.c.h.bf16 %v804_v53  ;;  %v825_v28 = vunpack.c.l.bf16 %v803_v49 }
 0x118   :  { %v827_v40 = vunpack.c.h.bf16 %v803_v49  ;;  %v3595_v44 = vadd.f32 %v3301_v16, %v194_v31  ;;  %v3598_v18 = vadd.f32 %v4377_v27, %v1037_v11  ;;  %942 = vmatpush1.bf16.xpose.msra.mxu1 %v803_v49  ;;  %v303_v26 = vadd.f32 %v238_v46, %v3456_v30  ;;  %v4379_v49 = vld [vmem:[#allocation33_spill] sm:$0xff] }
 0x119   :  { %v3601_v19 = vadd.f32 %v4378_v61, %v1038_v29  ;;  %v304_v5 = vadd.f32 %v238_v46, %v3460_v50  ;;  %v1035_v53 = vadd.f32 %v3374_v8, %v238_v46  ;;  %v1036_v48 = vadd.f32 %v3378_v0, %v238_v46  ;;  %v4380_v8 = vld [vmem:[#allocation42_spill] sm:$0xff] }
 0x11a   :  { %v858_v12 = vsub.f32 %v778_v23, %v826_v14  ;;  %v860_v13 = vsub.f32 %v780_v34, %v828_v55  ;;  %v857_v22 = vsub.f32 %v777_v4, %v825_v28  ;;  %v859_v16 = vsub.f32 %v779_v33, %v827_v40  ;;  %v345_v30 = vpop.permute.xlu1 %344 }
 0x11b   :  { %v3607_v31 = vpack.c.bf16 %v1328_v42, %v1326_v57  ;;  %v3609_v27 = vsub.f32 %v1329_v20, %v1377_v56  ;;  %v3611_v11 = vsub.f32 %v1331_v58, %v1379_v9  ;;  %v1290_v29 = vadd.f32 %v4379_v49, %v3341_v47 }
 0x11c   :  { %v884_v61 = vpack.c.bf16 %v860_v13, %v858_v12  ;;  %v883_v50 = vpack.c.bf16 %v859_v16, %v857_v22  ;;  %v1292_v32 = vadd.f32 %v4380_v8, %v3354_v45  ;;  %v1373_v0 = vunpack.c.l.bf16 %v3580_v35 }
 0x11d   :  { %v417_v28 = vmul.f32 %v4282_v10, %v345_v30  ;;  %v418_v23 = vmul.f32 %v4283_v43, %v345_v30  ;;  %v1085_v20 = vmul.f32 %v2684_v52, %v345_v30  ;;  %v1086_v14 = vmul.f32 %v4276_v59, %v345_v30  ;;  %v4402_v30 = vld [vmem:[#allocation65_spill] sm:$0xff] }
 0x11e   :  { %901 = vmatprep.subr.bf16.mxu0 %v884_v61  ;;  %v1374_v12 = vunpack.c.l.bf16 %v3607_v31  ;;  %v1376_v22 = vunpack.c.h.bf16 %v3607_v31  ;;  %v1322_v58 = vmax.f32 %v1290_v29, 0.0  ;;  %v1324_v9 = vmax.f32 %v1292_v32, 0.0 }
 0x11f   :  { %v449_v45 = vadd.f32 %v417_v28, %v303_v26  ;;  %v450_v55 = vadd.f32 %v418_v23, %v304_v5  ;;  %v1117_v34 = vadd.f32 %v1085_v20, %v1035_v53  ;;  %v1118_v4 = vadd.f32 %v1086_v14, %v1036_v48  ;;  %902 = vmatpush1.bf16.xpose.msra.mxu0 %v883_v50  ;;  %v491_v40 = vpop.permute.xlu1 %490  ;;  %v4385_v48 = vld [vmem:[#allocation51_spill] sm:$0xff] }
 0x120   :  { %v3626_v33 = vsub.f32 %v1326_v57, %v1374_v12  ;;  %v3628_v56 = vsub.f32 %v1328_v42, %v1376_v22  ;;  %v1375_v46 = vunpack.c.h.bf16 %v3580_v35  ;;  %v4381_v13 = vmax.f32 %v3246_v63, 0.0  ;;  %v4387_v23 = vld [vmem:[#allocation55_spill] sm:$0xff] }
 0x121   :  { %v4382_v49 = vmax.f32 %v3344_v39, 0.0  ;;  %v4383_v26 = vmax.f32 %v3384_v38, 0.0  ;;  %v1206_v57 = vadd.f32 %v4385_v48, %v3491_v62  ;;  %v3645_v42 = vadd.f32 %v3535_v17, %v3514_v25  ;;  %v4391_v48 = vld [vmem:[#allocation70_spill] sm:$0xff] }
 0x122   :  { %v3633_v16 = vsub.f32 %v4381_v13, %v1373_v0  ;;  %v563_v32 = vmul.f32 %v4284_v54, %v491_v40  ;;  %v564_v53 = vmul.f32 %v2929_v36, %v491_v40  ;;  %v1167_v63 = vmul.f32 %v4280_v6, %v491_v40  ;;  %v4388_v13 = vld [vmem:[#allocation35_spill] sm:$0xff] }
 0x123   :  { %v3639_v5 = vpack.c.bf16 %v4383_v26, %v4382_v49  ;;  %v1168_v29 = vmul.f32 %v4281_v24, %v491_v40  ;;  %v3653_v61 = vpack.c.bf16 %v1324_v9, %v1322_v58  ;;  %v4386_v50 = vmax.f32 %v3275_v2, 0.0  ;;  %v495_v14 = vpop.permute.xlu1 %494 }
 0x124   :  { %v1288_v25 = vadd.f32 %v3562_v41, %v1206_v57  ;;  %v595_v17 = vadd.f32 %v563_v32, %v449_v45  ;;  %v596_v8 = vadd.f32 %v564_v53, %v450_v55  ;;  %v1199_v0 = vadd.f32 %v1167_v63, %v1117_v34  ;;  %v4389_v55 = vld [vmem:[#allocation68_spill] sm:$0xff]  ;;  %v4392_v32 = vld [vmem:[#allocation19_spill] sm:$0xff] }
 0x125   :  { %4384 = vst [vmem:[#allocation67_spill] sm:$0xff] %v3639_v5  ;;  %v3657_v62 = vsub.f32 %v4386_v50, %v1375_v46  ;;  %v1200_v28 = vadd.f32 %v1168_v29, %v1118_v4  ;;  %v451_v20 = vadd.f32 %v4387_v23, %v305_v15  ;;  %v1370_v22 = vunpack.c.l.bf16 %v3653_v61 }
 0x126   :  { %v1372_v40 = vunpack.c.h.bf16 %v3653_v61  ;;  %v3666_v2 = vadd.f32 %v4388_v13, %v1199_v0  ;;  %v565_v46 = vmul.f32 %v4284_v54, %v495_v14  ;;  %v566_v41 = vmul.f32 %v2929_v36, %v495_v14 }
 0x127   :  { %v1169_v45 = vmul.f32 %v4280_v6, %v495_v14  ;;  %v452_v15 = vadd.f32 %v4389_v55, %v3595_v44  ;;  %v1170_v34 = vmul.f32 %v4281_v24, %v495_v14  ;;  %v3674_v4 = vsub.f32 %v1322_v58, %v1370_v22 }
 0x128   :  { %v1318_v49 = vmax.f32 %v3645_v42, 0.0  ;;  %v742_v57 = vadd.f32 %v4391_v48, %v596_v8  ;;  %v741_v53 = vadd.f32 %v4392_v32, %v595_v17  ;;  %v3680_v63 = vsub.f32 %v1324_v9, %v1372_v40  ;;  %v641_v44 = vpop.permute.xlu1 %640 }
 0x129   :  { %4390 = vst [vmem:[#allocation66_spill] sm:$0xff] %v3674_v4  ;;  %v1201_v26 = vadd.f32 %v1169_v45, %v3598_v18  ;;  %v597_v29 = vadd.f32 %v565_v46, %v451_v20  ;;  %v598_v50 = vadd.f32 %v566_v41, %v452_v15  ;;  %v1202_v0 = vadd.f32 %v1170_v34, %v3601_v19  ;;  %v4400_v45 = vld [vmem:[#allocation36_spill] sm:$0xff] }
 0x12a   :  { %v1320_v23 = vmax.f32 %v1288_v25, 0.0  ;;  %v1369_v14 = vunpack.c.l.bf16 %v3639_v5  ;;  %v1371_v42 = vunpack.c.h.bf16 %v3639_v5  ;;  %v4393_v18 = vmax.f32 %v3544_v1, 0.0 }
 0x12b   :  { %v4394_v8 = vmax.f32 %v3567_v7, 0.0  ;;  %v711_v9 = vmul.f32 %v4300_v37, %v641_v44  ;;  %v712_v20 = vmul.f32 %v4304_v3, %v641_v44  ;;  %v1251_v19 = vmul.f32 %v4289_v21, %v641_v44 }
 0x12c   :  { %v1252_v25 = vmul.f32 %v4290_v60, %v641_v44  ;;  %v3697_v22 = vpack.c.bf16 %v1320_v23, %v1318_v49  ;;  %v4396_v40 = vmax.f32 %v3344_v39, 0.0  ;;  %v4398_v46 = vmax.f32 %v3384_v38, 0.0 }
 0x12d   :  { %v3691_v17 = vpack.c.bf16 %v4394_v8, %v4393_v18  ;;  %v1282_v55 = vadd.f32 %v4400_v45, %v1200_v28  ;;  %v3708_v15 = vadd.f32 %v1251_v19, %v1201_v26  ;;  %v744_v34 = vadd.f32 %v712_v20, %v598_v50  ;;  %v4401_v26 = vld [vmem:[#allocation12_spill] sm:$0xff] }
 0x12e   :  { %4395 = vst [vmem:[#allocation20_spill] sm:$0xff] %v3697_v22  ;;  %v3701_v13 = vsub.f32 %v4396_v40, %v1369_v14  ;;  %v3705_v41 = vsub.f32 %v4398_v46, %v1371_v42  ;;  %v743_v48 = vadd.f32 %v711_v9, %v597_v29  ;;  %v1284_v32 = vadd.f32 %v1252_v25, %v1202_v0  ;;  %v97_v14 = vpop.permute.xlu1 %96 }
 0x12f   :  { %v774_v18 = vmax.f32 %v742_v57, 0.0  ;;  %v1366_v8 = vunpack.c.l.bf16 %v3697_v22  ;;  %v1368_v39 = vunpack.c.h.bf16 %v3697_v22  ;;  %v776_v40 = vmax.f32 %v744_v34, 0.0 }
 0x130   :  { %4397 = vst [vmem:[#allocation25_spill] sm:$0xff] %v3701_v13  ;;  %4399 = vst [vmem:[#allocation34_spill] sm:$0xff] %v3705_v41  ;;  %v773_v38 = vmax.f32 %v741_v53, 0.0  ;;  %v775_v42 = vmax.f32 %v743_v48, 0.0  ;;  %v1316_v46 = vmax.f32 %v1284_v32, 0.0  ;;  %v999_v28 = vmul.f32 %v2814_v51, %v97_v14  ;;  %v4403_v13 = vld [vmem:[#allocation69_spill] sm:$0xff] }
 0x131   :  { %v1000_v19 = vmul.f32 %v4401_v26, %v97_v14  ;;  %v1314_v50 = vmax.f32 %v1282_v55, 0.0  ;;  %v802_v29 = vpack.c.bf16 %v776_v40, %v774_v18  ;;  %v3716_v57 = vsub.f32 %v1318_v49, %v1366_v8 }
 0x132   :  { %v801_v0 = vpack.c.bf16 %v775_v42, %v773_v38  ;;  %v3718_v9 = vsub.f32 %v1320_v23, %v1368_v39  ;;  %v1365_v25 = vunpack.c.l.bf16 %v3691_v17  ;;  %v228_v45 = vpop.permute.xlu1 %227  ;;  %v1315_v44 = vmax.f32 %v3708_v15, 0.0 }
 0x133   :  { %v3720_v20 = vpack.c.bf16 %v1316_v46, %v1314_v50  ;;  %943 = vmatprep.subr.bf16.mxu1 %v802_v29  ;;  %v822_v53 = vunpack.c.l.bf16 %v802_v29  ;;  %v824_v34 = vunpack.c.h.bf16 %v802_v29  ;;  %v1031_v58 = vadd.f32 %v999_v28, %v228_v45 }
 0x134   :  { %v821_v48 = vunpack.c.l.bf16 %v801_v0  ;;  %v823_v32 = vunpack.c.h.bf16 %v801_v0  ;;  %v1032_v55 = vadd.f32 %v1000_v19, %v228_v45  ;;  %944 = vmatpush1.bf16.xpose.msra.mxu1 %v801_v0  ;;  %v1367_v49 = vunpack.c.h.bf16 %v3691_v17 }
 0x135   :  { %v854_v8 = vsub.f32 %v774_v18, %v822_v53  ;;  %v856_v23 = vsub.f32 %v776_v40, %v824_v34  ;;  %v1113_v47 = vadd.f32 %v4402_v30, %v1031_v58  ;;  %v1313_v22 = vmax.f32 %v3666_v2, 0.0  ;;  %v4406_v18 = vld [vmem:[#allocation11_spill] sm:$0xff] }
 0x136   :  { %v853_v39 = vsub.f32 %v773_v38, %v821_v48  ;;  %v855_v12 = vsub.f32 %v775_v42, %v823_v32  ;;  %v1114_v41 = vadd.f32 %v4403_v13, %v1032_v55  ;;  %v233_v29 = vpop.permute.xlu1 %232  ;;  %v4404_v28 = vmax.f32 %v3544_v1, 0.0  ;;  %v4407_v38 = vld [vmem:[#allocation58_spill] sm:$0xff]  ;;  %v4413_v55 = vld [vmem:[#allocation47_spill] sm:$0xff] }
 0x137   :  { %v882_v5 = vpack.c.bf16 %v856_v23, %v854_v8  ;;  %v1033_v40 = vadd.f32 %v4406_v18, %v233_v29  ;;  %v1034_v42 = vadd.f32 %v4407_v38, %v233_v29  ;;  %v4408_v30 = vmax.f32 %v3567_v7, 0.0  ;;  %v4412_v32 = vld [vmem:[#allocation10_spill] sm:$0xff]  ;;  %v4416_v23 = vld [vmem:[#allocation48_spill] sm:$0xff] }
 0x138   :  { %v881_v4 = vpack.c.bf16 %v855_v12, %v853_v39  ;;  %v3732_v19 = vsub.f32 %v4404_v28, %v1365_v25  ;;  %v1362_v2 = vunpack.c.l.bf16 %v3720_v20  ;;  %v1364_v12 = vunpack.c.h.bf16 %v3720_v20 }
 0x139   :  { %903 = vmatprep.subr.bf16.mxu0 %v882_v5  ;;  %v3738_v58 = vsub.f32 %v4408_v30, %v1367_v49  ;;  %v3742_v13 = vpack.c.bf16 %v1315_v44, %v1313_v22  ;;  %v189_v49 = vmul.f32 %v4413_v55, %v4412_v32  ;;  %v188_v39 = vmul.f32 %v4416_v23, %v97_v14  ;;  %v4417_v30 = vld [vmem:[#allocation62_spill] sm:$0xff] }
 0x13a   :  { %4405 = vst [vmem:[#allocation46_spill] sm:$0xff] %v3732_v19  ;;  %904 = vmatpush1.bf16.xpose.msra.mxu0 %v881_v4  ;;  %v3746_v0 = vsub.f32 %v1314_v50, %v1362_v2  ;;  %v3748_v25 = vsub.f32 %v1316_v46, %v1364_v12  ;;  %v187_v46 = vmul.f32 %v4413_v55, %v97_v14  ;;  %v4418_v4 = vld [vmem:[#allocation56_spill] sm:$0xff]  ;;  %v4419_v14 = vld [vmem:[#allocation57_spill] sm:$0xff] }
 0x13b   :  { %4409 = vst [vmem:[#allocation21_spill] sm:$0xff] %v3742_v13  ;;  %v1361_v5 = vunpack.c.l.bf16 %v3742_v13  ;;  %v1363_v7 = vunpack.c.h.bf16 %v3742_v13  ;;  %v190_v38 = vmul.f32 %v4416_v23, %v4412_v32  ;;  %v413_v2 = vmul.f32 %v4282_v10, %v4417_v30 }
 0x13c   :  { %4410 = vst [vmem:[#allocation22_spill] sm:$0xff] %v3746_v0  ;;  %4411 = vst [vmem:[#allocation76_spill] sm:$0xff] %v3748_v25  ;;  %v414_v12 = vmul.f32 %v4283_v43, %v4417_v30  ;;  %v301_v15 = vadd.f32 %v233_v29, %v189_v49 }
 0x13d   :  { %v3758_v8 = vsub.f32 %v1313_v22, %v1361_v5  ;;  %v3760_v50 = vsub.f32 %v1315_v44, %v1363_v7  ;;  %v299_v44 = vadd.f32 %v228_v45, %v187_v46  ;;  %v300_v5 = vadd.f32 %v228_v45, %v188_v39 }
 0x13e   :  { %v341_v53 = vpop.permute.xlu1 %340  ;;  %v302_v30 = vadd.f32 %v233_v29, %v190_v38  ;;  %v4420_v29 = vld [vmem:[#allocation54_spill] sm:$0xff] }
 0x13f   :  { %v1083_v34 = vmul.f32 %v2684_v52, %v341_v53  ;;  %v1084_v48 = vmul.f32 %v4276_v59, %v341_v53  ;;  %4414 = vst [vmem:[#allocation18_spill] sm:$0xff] %v3758_v8  ;;  %4415 = vst [vmem:[#allocation37_spill] sm:$0xff] %v3760_v50  ;;  %v445_v39 = vadd.f32 %v413_v2, %v299_v44 }
 0x140   :  { %v561_v38 = vmul.f32 %v4284_v54, %v4420_v29 }
 0x141   :  { %v1115_v28 = vadd.f32 %v1083_v34, %v1033_v40  ;;  %v1116_v18 = vadd.f32 %v1084_v48, %v1034_v42  ;;  %v415_v42 = vmul.f32 %v4282_v10, %v341_v53  ;;  %v416_v34 = vmul.f32 %v4283_v43, %v341_v53 }
 0x143   :  { %v483_v7 = vpop.permute.xlu1 %482  ;;  %v1197_v1 = vadd.f32 %v4418_v4, %v1115_v28  ;;  %v1198_v40 = vadd.f32 %v4419_v14, %v1116_v18  ;;  %v446_v4 = vadd.f32 %v414_v12, %v300_v5  ;;  %v447_v28 = vadd.f32 %v415_v42, %v301_v15 }
 0x144   :  { %v1163_v48 = vmul.f32 %v4280_v6, %v483_v7  ;;  %v1164_v32 = vmul.f32 %v4281_v24, %v483_v7  ;;  %v560_v13 = vmul.f32 %v2929_v36, %v483_v7  ;;  %v559_v45 = vmul.f32 %v4284_v54, %v483_v7 }
 0x145   :  { %v448_v18 = vadd.f32 %v416_v34, %v302_v30  ;;  %v593_v42 = vadd.f32 %v561_v38, %v447_v28  ;;  %v4421_v38 = vld [vmem:[#allocation44_spill] sm:$0xff] }
 0x146   :  { %v1195_v22 = vadd.f32 %v1163_v48, %v1113_v47  ;;  %v1196_v46 = vadd.f32 %v1164_v32, %v1114_v41  ;;  %v562_v47 = vmul.f32 %v2929_v36, %v4420_v29  ;;  %v592_v41 = vadd.f32 %v560_v13, %v446_v4 }
 0x147   :  { %v591_v2 = vadd.f32 %v559_v45, %v445_v39 }
 0x148   :  { %v629_v14 = vpop.permute.xlu1 %628  ;;  %v594_v5 = vadd.f32 %v562_v47, %v448_v18 }
 0x149   :  { %v705_v8 = vmul.f32 %v4300_v37, %v629_v14  ;;  %v706_v53 = vmul.f32 %v4304_v3, %v629_v14  ;;  %v1245_v50 = vmul.f32 %v4289_v21, %v629_v14  ;;  %v1246_v49 = vmul.f32 %v4290_v60, %v629_v14 }
 0x14b   :  { %v1277_v12 = vadd.f32 %v1245_v50, %v1195_v22  ;;  %v3788_v15 = vadd.f32 %v1246_v49, %v1196_v46  ;;  %v738_v7 = vadd.f32 %v706_v53, %v592_v41  ;;  %v737_v30 = vadd.f32 %v705_v8, %v591_v2  ;;  %v4422_v2 = vld [vmem:[#allocation43_spill] sm:$0xff] }
 0x14c   :  { %v633_v44 = vpop.permute.xlu1 %632  ;;  %v1080_v8 = vmul.f32 %v4276_v59, %v4421_v38 }
 0x14d   :  { %v707_v34 = vmul.f32 %v4300_v37, %v633_v44  ;;  %v708_v48 = vmul.f32 %v4304_v3, %v633_v44  ;;  %v1247_v32 = vmul.f32 %v4289_v21, %v633_v44  ;;  %v1248_v14 = vmul.f32 %v4290_v60, %v633_v44 }
 0x14e   :  { %v1309_v45 = vmax.f32 %v1277_v12, 0.0  ;;  %v770_v50 = vmax.f32 %v738_v7, 0.0  ;;  %v769_v18 = vmax.f32 %v737_v30, 0.0 }
 0x14f   :  { %v1279_v0 = vadd.f32 %v1247_v32, %v1197_v1  ;;  %v740_v29 = vadd.f32 %v708_v48, %v594_v5  ;;  %v739_v13 = vadd.f32 %v707_v34, %v593_v42  ;;  %v1280_v22 = vadd.f32 %v1248_v14, %v1198_v40  ;;  %v4424_v32 = vld [vmem:[#allocation74_spill] sm:$0xff]  ;;  %v4425_v14 = vld [vmem:[#allocation39_spill] sm:$0xff] }
 0x151   :  { %v1311_v46 = vmax.f32 %v1279_v0, 0.0  ;;  %v772_v4 = vmax.f32 %v740_v29, 0.0  ;;  %v771_v28 = vmax.f32 %v739_v13, 0.0  ;;  %v1312_v0 = vmax.f32 %v1280_v22, 0.0 }
 0x152   :  { %v92_v39 = vpop.permute.xlu1 %91  ;;  %v1310_v13 = vmax.f32 %v3788_v15, 0.0 }
 0x153   :  { %v997_v53 = vmul.f32 %v2814_v51, %v92_v39  ;;  %v998_v49 = vmul.f32 %v4401_v26, %v92_v39  ;;  %v800_v47 = vpack.c.bf16 %v772_v4, %v770_v50  ;;  %v799_v41 = vpack.c.bf16 %v771_v28, %v769_v18  ;;  %v4423_v51 = vld [vmem:[#allocation73_spill] sm:$0xff] }
 0x154   :  { %v3798_v1 = vpack.c.bf16 %v1311_v46, %v1309_v45 }
 0x155   :  { %v1029_v12 = vadd.f32 %v997_v53, %v4422_v2  ;;  %v1030_v40 = vadd.f32 %v998_v49, %v4422_v2  ;;  %945 = vmatprep.subr.bf16.mxu1 %v800_v47  ;;  %v818_v44 = vunpack.c.l.bf16 %v800_v47  ;;  %v820_v5 = vunpack.c.h.bf16 %v800_v47 }
 0x156   :  { %v817_v7 = vunpack.c.l.bf16 %v799_v41  ;;  %v819_v42 = vunpack.c.h.bf16 %v799_v41  ;;  %v218_v48 = vpop.permute.xlu1 %217  ;;  %946 = vmatpush1.bf16.xpose.msra.mxu1 %v799_v41  ;;  %v3810_v47 = vpack.c.bf16 %v1312_v0, %v1310_v13  ;;  %v1357_v19 = vunpack.c.l.bf16 %v3798_v1 }
 0x157   :  { %v3803_v34 = vadd.f32 %v4423_v51, %v1029_v12  ;;  %v3805_v26 = vadd.f32 %v1080_v8, %v1030_v40  ;;  %v1027_v30 = vadd.f32 %v4424_v32, %v218_v48  ;;  %v1028_v29 = vadd.f32 %v4425_v14, %v218_v48 }
 0x158   :  { %v850_v53 = vsub.f32 %v770_v50, %v818_v44  ;;  %v852_v22 = vsub.f32 %v772_v4, %v820_v5  ;;  %v849_v49 = vsub.f32 %v769_v18, %v817_v7  ;;  %v851_v25 = vsub.f32 %v771_v28, %v819_v42  ;;  %v4426_v50 = vld [vmem:[#allocation41_spill] sm:$0xff] }
 0x159   :  { %v1359_v12 = vunpack.c.h.bf16 %v3798_v1  ;;  %v1358_v41 = vunpack.c.l.bf16 %v3810_v47  ;;  %v1360_v32 = vunpack.c.h.bf16 %v3810_v47  ;;  %v3816_v14 = vsub.f32 %v1309_v45, %v1357_v19 }
 0x15a   :  { %v880_v8 = vpack.c.bf16 %v852_v22, %v850_v53  ;;  %v879_v40 = vpack.c.bf16 %v851_v25, %v849_v49  ;;  %v183_v4 = vmul.f32 %v4413_v55, %v4426_v50  ;;  %v184_v25 = vmul.f32 %v4416_v23, %v4426_v50  ;;  %v4427_v49 = vld [vmem:[#allocation14_spill] sm:$0xff] }
 0x15b   :  { %v329_v51 = vpop.permute.xlu1 %328  ;;  %v3818_v15 = vsub.f32 %v1311_v46, %v1359_v12  ;;  %v3826_v44 = vsub.f32 %v1310_v13, %v1358_v41  ;;  %v3828_v5 = vsub.f32 %v1312_v0, %v1360_v32  ;;  %v185_v45 = vmul.f32 %v4413_v55, %v92_v39 }
 0x15c   :  { %v1077_v18 = vmul.f32 %v2684_v52, %v329_v51  ;;  %v1078_v28 = vmul.f32 %v4276_v59, %v329_v51  ;;  %905 = vmatprep.subr.bf16.mxu0 %v880_v8  ;;  %v186_v46 = vmul.f32 %v4416_v23, %v92_v39  ;;  %v409_v59 = vmul.f32 %v4282_v10, %v329_v51 }
 0x15d   :  { %906 = vmatpush1.bf16.xpose.msra.mxu0 %v879_v40  ;;  %v1419_v19 = vpack.c.bf16 %v3818_v15, %v3816_v14  ;;  %v410_v42 = vmul.f32 %v4283_v43, %v329_v51  ;;  %v1420_v53 = vpack.c.bf16 %v3828_v5, %v3826_v44  ;;  %v295_v13 = vadd.f32 %v218_v48, %v183_v4  ;;  %v2283_v14 = vld [vmem:[%s4097_s3 + $0x10] sm:$0xff]   ;;  %v2284_v15 = vld [vmem:[%s4097_s3 + $0x8] sm:$0xff]   ;;  %v2285_v44 = vld [vmem:[%s4097_s3] sm:$0xff]  }
 0x15e   :  { %v1109_v7 = vadd.f32 %v1077_v18, %v1027_v30  ;;  %v1110_v52 = vadd.f32 %v1078_v28, %v1028_v29  ;;  %v296_v22 = vadd.f32 %v218_v48, %v184_v25  ;;  %v1242_v12 = vmul.f32 %v4290_v60, %v4427_v49 }
 0x15f   :  { %v297_v30 = vadd.f32 %v4422_v2, %v185_v45  ;;  %v298_v29 = vadd.f32 %v4422_v2, %v186_v46  ;;  %v411_v40 = vmul.f32 %v4282_v10, %v4421_v38  ;;  %v412_v48 = vmul.f32 %v4283_v43, %v4421_v38  ;;  %v4428_v2 = vld [vmem:[#allocation45_spill] sm:$0xff] }
 0x160   :  { %v475_v0 = vpop.permute.xlu1 %474  ;;  %v441_v51 = vadd.f32 %v409_v59, %v295_v13  ;;  %v442_v41 = vadd.f32 %v410_v42, %v296_v22  ;;  %v701_v4 = vmul.f32 %v4300_v37, %v4427_v49  ;;  %v702_v18 = vmul.f32 %v4304_v3, %v4427_v49 }
 0x161   :  { %v555_v8 = vmul.f32 %v4284_v54, %v475_v0  ;;  %v556_v55 = vmul.f32 %v2929_v36, %v475_v0  ;;  %v1159_v23 = vmul.f32 %v4280_v6, %v475_v0  ;;  %v1160_v39 = vmul.f32 %v4281_v24, %v475_v0 }
 0x162   :  { %v444_v59 = vadd.f32 %v412_v48, %v298_v29 }
 0x163   :  { %v1191_v32 = vadd.f32 %v1159_v23, %v1109_v7  ;;  %v1192_v50 = vadd.f32 %v1160_v39, %v1110_v52  ;;  %v587_v25 = vadd.f32 %v555_v8, %v441_v51  ;;  %v588_v45 = vadd.f32 %v556_v55, %v442_v41 }
 0x164   :  { %v479_v28 = vpop.permute.xlu1 %478  ;;  %v443_v52 = vadd.f32 %v411_v40, %v297_v30 }
 0x165   :  { %v1273_v46 = vadd.f32 %v4428_v2, %v1191_v32  ;;  %v1274_v0 = vadd.f32 %v1242_v12, %v1192_v50  ;;  %v557_v10 = vmul.f32 %v4284_v54, %v479_v28  ;;  %v558_v43 = vmul.f32 %v2929_v36, %v479_v28 }
 0x166   :  { %v1161_v38 = vmul.f32 %v4280_v6, %v479_v28  ;;  %v1162_v7 = vmul.f32 %v4281_v24, %v479_v28  ;;  %v733_v22 = vadd.f32 %v701_v4, %v587_v25  ;;  %v734_v49 = vadd.f32 %v702_v18, %v588_v45 }
 0x167   :  { %v589_v55 = vadd.f32 %v557_v10, %v443_v52  ;;  %v590_v23 = vadd.f32 %v558_v43, %v444_v59  ;;  %v1306_v48 = vmax.f32 %v1274_v0, 0.0  ;;  %v4429_v43 = vld [vmem:[#allocation64_spill] sm:$0xff] }
 0x168   :  { %v1193_v42 = vadd.f32 %v1161_v38, %v3803_v34  ;;  %v1194_v13 = vadd.f32 %v1162_v7, %v3805_v26  ;;  %v1305_v34 = vmax.f32 %v1273_v46, 0.0  ;;  %v766_v40 = vmax.f32 %v734_v49, 0.0 }
 0x169   :  { %v625_v8 = vpop.permute.xlu1 %624  ;;  %v765_v26 = vmax.f32 %v733_v22, 0.0 }
 0x16a   :  { %v703_v12 = vmul.f32 %v4300_v37, %v625_v8  ;;  %v704_v54 = vmul.f32 %v4304_v3, %v625_v8  ;;  %v1243_v36 = vmul.f32 %v4289_v21, %v625_v8  ;;  %v1244_v6 = vmul.f32 %v4290_v60, %v625_v8 }
 0x16c   :  { %v735_v24 = vadd.f32 %v703_v12, %v589_v55  ;;  %v736_v39 = vadd.f32 %v704_v54, %v590_v23  ;;  %v1275_v30 = vadd.f32 %v1243_v36, %v1193_v42  ;;  %v1276_v29 = vadd.f32 %v1244_v6, %v1194_v13  ;;  %v4430_v12 = vld [vmem:[#allocation16_spill] sm:$0xff]  ;;  %v4431_v54 = vld [vmem:[#allocation13_spill] sm:$0xff] }
 0x16d   :  { %v4432_v36 = vpack.c.bf16 %v4430_v12, %v4431_v54  ;;  %v4433_v6 = vmov 1065369472   ;;  %v2286_v54 = vld [vmem:[%s4100_s6 + $0x38] sm:$0xff]  }
 0x16e   :  { %v1307_v51 = vmax.f32 %v1275_v30, 0.0  ;;  %v768_v41 = vmax.f32 %v736_v39, 0.0  ;;  %v767_v32 = vmax.f32 %v735_v24, 0.0  ;;  %v1308_v50 = vmax.f32 %v1276_v29, 0.0  ;;  %v4434_v24 = vld [vmem:[#allocation75_spill] sm:$0xff]  ;;  %v4435_v39 = vld [vmem:[#allocation17_spill] sm:$0xff] }
 0x16f   :  { %v4436_v30 = vld [vmem:[#allocation71_spill] sm:$0xff]  ;;  %v4437_v29 = vld [vmem:[#allocation72_spill] sm:$0xff] }
 0x170   :  { %v798_v4 = vpack.c.bf16 %v768_v41, %v766_v40  ;;  %v797_v37 = vpack.c.bf16 %v767_v32, %v765_v26  ;;  %v1338_v18 = vpack.c.bf16 %v1308_v50, %v1306_v48  ;;  %v1337_v3 = vpack.c.bf16 %v1307_v51, %v1305_v34 }
 0x172   :  { %947 = vmatprep.subr.bf16.mxu1 %v798_v4  ;;  %v814_v21 = vunpack.c.l.bf16 %v798_v4  ;;  %v816_v28 = vunpack.c.h.bf16 %v798_v4  ;;  %v813_v60 = vunpack.c.l.bf16 %v797_v37  ;;  %v815_v25 = vunpack.c.h.bf16 %v797_v37  ;;  %v4446_v4 = vld [vmem:[#allocation66_spill] sm:$0xff] }
 0x173   :  { %948 = vmatpush1.bf16.xpose.msra.mxu1 %v797_v37  ;;  %v1354_v45 = vunpack.c.l.bf16 %v1338_v18  ;;  %v1356_v2 = vunpack.c.h.bf16 %v1338_v18  ;;  %v1353_v46 = vunpack.c.l.bf16 %v1337_v3  ;;  %v1355_v10 = vunpack.c.h.bf16 %v1337_v3 }
 0x174   :  { %1473 = vmatprep.subr.bf16.mxu1 %v4429_v43  ;;  %v846_v0 = vsub.f32 %v766_v40, %v814_v21  ;;  %v848_v38 = vsub.f32 %v768_v41, %v816_v28  ;;  %v845_v7 = vsub.f32 %v765_v26, %v813_v60  ;;  %v847_v52 = vsub.f32 %v767_v32, %v815_v25  ;;  %v4439_v40 = vld [vmem:[#allocation53_spill] sm:$0xff]  ;;  %v4440_v26 = vld [vmem:[#allocation52_spill] sm:$0xff]  ;;  %v4461_v25 = vld [vmem:[#allocation18_spill] sm:$0xff] }
 0x175   :  { %v1386_v59 = vsub.f32 %v1306_v48, %v1354_v45  ;;  %v1388_v42 = vsub.f32 %v1308_v50, %v1356_v2  ;;  %v1385_v13 = vsub.f32 %v1305_v34, %v1353_v46  ;;  %v1387_v22 = vsub.f32 %v1307_v51, %v1355_v10  ;;  %v4442_v51 = vld [vmem:[#allocation32_spill] sm:$0xff]  ;;  %v4451_v21 = vld [vmem:[#allocation25_spill] sm:$0xff] }
 0x176   :  { %v878_v49 = vpack.c.bf16 %v848_v38, %v846_v0  ;;  %v877_v8 = vpack.c.bf16 %v847_v52, %v845_v7  ;;  %v4438_v34 = vpack.c.bf16 %v4436_v30, %v4437_v29  ;;  %v4441_v48 = vpack.c.bf16 %v4439_v40, %v4440_v26  ;;  %v4459_v28 = vld [vmem:[#allocation21_spill] sm:$0xff]  ;;  %v2291_v26 = vld [vmem:[%s4100_s6 + $0x10] sm:$0xff]  }
 0x177   :  { %v1418_v55 = vpack.c.bf16 %v1388_v42, %v1386_v59  ;;  %v1417_v23 = vpack.c.bf16 %v1387_v22, %v1385_v13  ;;  %v4443_v41 = vpack.c.bf16 %v3611_v11, %v3609_v27  ;;  %v4444_v32 = vpack.c.bf16 %v3628_v56, %v3626_v33  ;;  %v4449_v27 = vld [vmem:[#allocation20_spill] sm:$0xff]  ;;  %v4450_v11 = vld [vmem:[#allocation34_spill] sm:$0xff]  ;;  %v4460_v60 = vld [vmem:[#allocation37_spill] sm:$0xff] }
 0x178   :  { %907 = vmatprep.subr.bf16.mxu0 %v878_v49  ;;  %v4445_v50 = vpack.c.bf16 %v3657_v62, %v3633_v16  ;;  %v4447_v37 = vpack.c.bf16 %v3680_v63, %v4446_v4  ;;  %v4452_v33 = vpack.c.bf16 %v4450_v11, %v4451_v21  ;;  %v4454_v56 = vld [vmem:[#allocation46_spill] sm:$0xff]  ;;  %v2289_v30 = vld [vmem:[%s4100_s6 + $0x20] sm:$0xff]  }
 0x179   :  { %908 = vmatpush1.bf16.xpose.msra.mxu0 %v877_v8  ;;  %v4455_v16 = vpack.c.bf16 %v3738_v58, %v4454_v56  ;;  %v4457_v62 = vld [vmem:[#allocation22_spill] sm:$0xff]  ;;  %v2297_v40 = vld [vmem:[%s4102_s8 + $0x20] sm:$0xff]  }
 0x17a   :  { %1433 = vmatprep.subr.bf16.mxu0 %v4432_v36  ;;  %966 = vmatmul.mubr.bf16.vlgmr.msra.gmra.mxu1 %v4433_v6  ;;  %v2280_v58 = vld [vmem:[%s4097_s3 + $0x28] sm:$0xff]   ;;  %v2287_v36 = vld [vmem:[%s4100_s6 + $0x30] sm:$0xff]  }
 0x17b   :  { %1474 = vmatpush1.bf16.xpose.msra.mxu1 %v4434_v24  ;;  %1505 = vmatprep.mubr.bf16.mxu1 %v4433_v6  ;;  %v2294_v24 = vld [vmem:[%s4102_s8 + $0x38] sm:$0xff]   ;;  %v2296_v29 = vld [vmem:[%s4102_s8 + $0x28] sm:$0xff]  }
 0x17c   :  { %1475 = vmatprep.subr.bf16.mxu1 %v4435_v39  ;;  %v2295_v39 = vld [vmem:[%s4102_s8 + $0x30] sm:$0xff]  }
 0x180   :  { %926 = vmatmul.mubr.bf16.vlgmr.msra.gmra.mxu0 %v4433_v6 }
 0x181   :  { %1434 = vmatpush1.bf16.xpose.msra.mxu0 %v4438_v34  ;;  %1465 = vmatprep.mubr.bf16.mxu0 %v4433_v6  ;;  %v2290_v34 = vld [vmem:[%s4100_s6 + $0x18] sm:$0xff]  }
 0x182   :  { %1435 = vmatprep.subr.bf16.mxu0 %v4441_v48  ;;  %v2298_v48 = vld [vmem:[%s4102_s8 + $0x18] sm:$0xff]  }
 0x183   :  { %1476 = vmatpush1.bf16.xpose.msra.mxu1 %v4442_v51  ;;  %v2292_v51 = vld [vmem:[%s4100_s6 + $0x8] sm:$0xff]  }
 0x184   :  { %1477 = vmatprep.subr.bf16.mxu1 %v3607_v31  ;;  %v4448_v31 = vld [vmem:[#allocation67_spill] sm:$0xff] }
 0x189   :  { %1436 = vmatpush1.bf16.xpose.msra.mxu0 %v4443_v41  ;;  %v2299_v41 = vld [vmem:[%s4102_s8 + $0x10] sm:$0xff]  }
 0x18a   :  { %1437 = vmatprep.subr.bf16.mxu0 %v4444_v32  ;;  %v2293_v32 = vld [vmem:[%s4100_s6] sm:$0xff]  }
 0x18b   :  { %1478 = vmatpush1.bf16.xpose.msra.mxu1 %v3580_v35  ;;  %v4453_v35 = vpack.c.bf16 %v3718_v9, %v3716_v57  ;;  %v4462_v57 = vpack.c.bf16 %v4460_v60, %v4461_v25  ;;  %v2383_v9 = vmov 0.0  }
 0x18c   :  { %1479 = vmatprep.subr.bf16.mxu1 %v3653_v61  ;;  %v4456_v61 = vld [vmem:[#allocation76_spill] sm:$0xff] }
 0x18d   :  { %v4458_v63 = vpack.c.bf16 %v4456_v61, %v4457_v62 }
 0x191   :  { %1438 = vmatpush1.bf16.xpose.msra.mxu0 %v4445_v50  ;;  %v2300_v50 = vld [vmem:[%s4102_s8 + $0x8] sm:$0xff]  }
 0x192   :  { %1439 = vmatprep.subr.bf16.mxu0 %v4447_v37 }
 0x193   :  { %1480 = vmatpush1.bf16.xpose.msra.mxu1 %v4448_v31 }
 0x194   :  { %1481 = vmatprep.subr.bf16.mxu1 %v4449_v27 }
 0x199   :  { %1440 = vmatpush1.bf16.xpose.msra.mxu0 %v4452_v33 }
 0x19a   :  { %1441 = vmatprep.subr.bf16.mxu0 %v4453_v35 }
 0x19b   :  { %1482 = vmatpush1.bf16.xpose.msra.mxu1 %v3691_v17  ;;  %v2278_v17 = vld [vmem:[%s4097_s3 + $0x38] sm:$0xff]  }
 0x19c   :  { %1483 = vmatprep.subr.bf16.mxu1 %v3720_v20  ;;  %v2279_v20 = vld [vmem:[%s4097_s3 + $0x30] sm:$0xff]  }
 0x1a1   :  { %1442 = vmatpush1.bf16.xpose.msra.mxu0 %v4455_v16 }
 0x1a2   :  { %1443 = vmatprep.subr.bf16.mxu0 %v4458_v63 }
 0x1a3   :  { %1484 = vmatpush1.bf16.xpose.msra.mxu1 %v4459_v28 }
 0x1a4   :  { %1485 = vmatprep.subr.bf16.mxu1 %v3810_v47  ;;  %v2282_v47 = vld [vmem:[%s4097_s3 + $0x18] sm:$0xff]  }
 0x1a9   :  { %1444 = vmatpush1.bf16.xpose.msra.mxu0 %v4462_v57 }
 0x1aa   :  { %1445 = vmatprep.subr.bf16.mxu0 %v1420_v53 }
 0x1ab   :  { %1486 = vmatpush1.bf16.xpose.msra.mxu1 %v3798_v1  ;;  %v2281_v1 = vld [vmem:[%s4097_s3 + $0x20] sm:$0xff]  }
 0x1ac   :  { %1487 = vmatprep.subr.bf16.mxu1 %v1338_v18 }
 0x1b1   :  { %1446 = vmatpush1.bf16.xpose.msra.mxu0 %v1419_v19 }
 0x1b2   :  { %1447 = vmatprep.subr.bf16.mxu0 %v1418_v55 }
 0x1b3   :  { %1488 = vmatpush1.bf16.xpose.msra.mxu1 %v1337_v3 }
 0x1b4   :  { %2170 = vmatprep.subr.bf16.mxu1 %v2383_v9 }
 0x1b9   :  { %1448 = vmatpush1.bf16.xpose.msra.mxu0 %v1417_v23 }
 0x1ba   :  { %1506 = vmatmul.mubr.bf16.vlgmr.msra.gmra.mxu1 %v4433_v6  ;;  %2150 = vmatprep.subr.bf16.mxu0 %v2383_v9 }
 0x1bb   :  { %2186 = vmatprep.mubr.msk.bf16.mxu1 %vm2384_vm0, %v2383_v9  ;;  %2171 = vmatpush3.bf16.msra.mxu1 %v2286_v54 }
 0x1bc   :  { %2172 = vmatprep.subr.bf16.mxu1 %v2383_v9 }
 0x1bf   :  { %2173 = vmatpush3.bf16.msra.mxu1 %v2287_v36 }
 0x1c0   :  { %1466 = vmatmul.mubr.bf16.vlgmr.msra.gmra.mxu0 %v4433_v6  ;;  %v2288_v6 = vld [vmem:[%s4100_s6 + $0x28] sm:$0xff]   ;;  %2174 = vmatprep.subr.bf16.mxu1 %v2383_v9 }
 0x1c1   :  { %2151 = vmatpush3.bf16.msra.mxu0 %v2278_v17  ;;  %2166 = vmatprep.mubr.msk.bf16.mxu0 %vm2384_vm0, %v2383_v9 }
 0x1c2   :  { %2152 = vmatprep.subr.bf16.mxu0 %v2383_v9 }
 0x1c3   :  { %2175 = vmatpush3.bf16.msra.mxu1 %v2288_v6 }
 0x1c4   :  { %2176 = vmatprep.subr.bf16.mxu1 %v2383_v9 }
 0x1c5   :  { %2153 = vmatpush3.bf16.msra.mxu0 %v2279_v20 }
 0x1c6   :  { %2154 = vmatprep.subr.bf16.mxu0 %v2383_v9 }
 0x1c7   :  { %2177 = vmatpush3.bf16.msra.mxu1 %v2289_v30 }
 0x1c8   :  { %2178 = vmatprep.subr.bf16.mxu1 %v2383_v9 }
 0x1c9   :  { %2155 = vmatpush3.bf16.msra.mxu0 %v2280_v58 }
 0x1ca   :  { %2156 = vmatprep.subr.bf16.mxu0 %v2383_v9 }
 0x1cb   :  { %2179 = vmatpush3.bf16.msra.mxu1 %v2290_v34 }
 0x1cc   :  { %2180 = vmatprep.subr.bf16.mxu1 %v2383_v9 }
 0x1cd   :  { %2157 = vmatpush3.bf16.msra.mxu0 %v2281_v1 }
 0x1ce   :  { %2158 = vmatprep.subr.bf16.mxu0 %v2383_v9 }
 0x1cf   :  { %2181 = vmatpush3.bf16.msra.mxu1 %v2291_v26 }
 0x1d0   :  { %2182 = vmatprep.subr.bf16.mxu1 %v2383_v9 }
 0x1d1   :  { %2159 = vmatpush3.bf16.msra.mxu0 %v2282_v47 }
 0x1d2   :  { %2160 = vmatprep.subr.bf16.mxu0 %v2383_v9 }
 0x1d3   :  { %2183 = vmatpush3.bf16.msra.mxu1 %v2292_v51 }
 0x1d4   :  { %2184 = vmatprep.subr.bf16.mxu1 %v2383_v9 }
 0x1d5   :  { %2161 = vmatpush3.bf16.msra.mxu0 %v2283_v14 }
 0x1d6   :  { %2162 = vmatprep.subr.bf16.mxu0 %v2383_v9 }
 0x1d7   :  { %2185 = vmatpush3.bf16.msra.mxu1 %v2293_v32 }
 0x1d8   :  { %2210 = vmatprep.subr.bf16.mxu1 %v2383_v9 }
 0x1d9   :  { %2163 = vmatpush3.bf16.msra.mxu0 %v2284_v15 }
 0x1da   :  { %2164 = vmatprep.subr.bf16.mxu0 %v2383_v9 }
 0x1dd   :  { %2165 = vmatpush3.bf16.msra.mxu0 %v2285_v44  ;;  %v2084_v44 = vld [vmem:[%s4098_s4] ss:$0 sm:$0xff] }
 0x1de   :  { %2190 = vmatprep.subr.bf16.mxu0 %v2383_v9 }
 0x23a   :  { %v967_v5 = vpop.f32.mrf.mxu1 }
 0x23c   :  { %v969_v19 = vpop.f32.mrf.mxu1 }
 0x23d   :  { %v2085_v19 = vld [vmem:[%s4099_s5] ss:$0 sm:$0xff] }
 0x23e   :  { %v970_v53 = vpop.f32.mrf.mxu1 }
 0x240   :  { %v927_v18 = vpop.f32.mrf.mxu0  ;;  %v971_v3 = vpop.f32.mrf.mxu1 }
 0x241   :  { %v968_v45 = vadd.f32 %v967_v5, %v927_v18 }
 0x242   :  { %v929_v2 = vpop.f32.mrf.mxu0 }
 0x243   :  { %v973_v49 = vmul.f32 0.00390625, %v968_v45  ;;  %v2301_v2 = vld [vmem:[%s4102_s8] sm:$0xff]  }
 0x244   :  { %v930_v46 = vpop.f32.mrf.mxu0 }
 0x245   :  { %v2086_v46 = vld [vmem:[%s4101_s7] ss:$0 sm:$0xff] }
 0x246   :  { %v931_v10 = vpop.f32.mrf.mxu0 }
 0x27a   :  { %v1507_v43 = vpop.f32.mrf.mxu1 }
 0x27c   :  { %v1509_v0 = vpop.f32.mrf.mxu1 }
 0x27e   :  { %v1510_v38 = vpop.f32.mrf.mxu1 }
 0x280   :  { %v1467_v7 = vpop.f32.mrf.mxu0  ;;  %v1511_v52 = vpop.f32.mrf.mxu1 }
 0x281   :  { %v1508_v59 = vadd.f32 %v1507_v43, %v1467_v7 }
 0x282   :  { %v1469_v42 = vpop.f32.mrf.mxu0 }
 0x283   :  { %v1513_v13 = vmul.f32 0.00390625, %v1508_v59  ;;  %v2302_v59 = vld [vmem:[%s4105_s11 + $0x38] sm:$0xff]   ;;  %v2303_v42 = vld [vmem:[%s4105_s11 + $0x30] sm:$0xff]  }
 0x284   :  { %v1470_v22 = vpop.f32.mrf.mxu0 }
 0x285   :  { %v1515_v8 = vrot.slane %v1513_v13, 7  ;;  %v2304_v13 = vld [vmem:[%s4105_s11 + $0x28] sm:$0xff]   ;;  %v2305_v22 = vld [vmem:[%s4105_s11 + $0x20] sm:$0xff]  }
 0x286   :  { %v1471_v55 = vpop.f32.mrf.mxu0 }
 0x287   :  { %v1518_v23 = vsel %vm1517_vm1, %v973_v49, %v1515_v8  ;;  %v2306_v49 = vld [vmem:[%s4105_s11 + $0x18] sm:$0xff]   ;;  %v2307_v8 = vld [vmem:[%s4105_s11 + $0x10] sm:$0xff]   ;;  %v2308_v55 = vld [vmem:[%s4105_s11 + $0x8] sm:$0xff]  }
 0x288   :  { %v1520_v12 = vpack.c.bf16 %v1518_v23, %v1518_v23  ;;  %1519 = vst [vmem:[#allocation2] sm:$0x3] %v1518_v23  ;;  %v2309_v23 = vld [vmem:[%s4105_s11] sm:$0xff]  }
 0x28a   :  { %2167 = vmatmul.mubr.bf16.vlgmr.msra.gmra.mxu0 %v1520_v12 }
 0x28b   :  { %2206 = vmatprep.mubr.msk.bf16.mxu0 %vm2384_vm0, %v2383_v9  ;;  %2191 = vmatpush3.bf16.msra.mxu0 %v2294_v24 }
 0x28c   :  { %2192 = vmatprep.subr.bf16.mxu0 %v2383_v9 }
 0x28f   :  { %2193 = vmatpush3.bf16.msra.mxu0 %v2295_v39 }
 0x290   :  { %2194 = vmatprep.subr.bf16.mxu0 %v2383_v9 }
 0x293   :  { %2195 = vmatpush3.bf16.msra.mxu0 %v2296_v29 }
 0x294   :  { %2196 = vmatprep.subr.bf16.mxu0 %v2383_v9 }
 0x297   :  { %2197 = vmatpush3.bf16.msra.mxu0 %v2297_v40 }
 0x298   :  { %2198 = vmatprep.subr.bf16.mxu0 %v2383_v9 }
 0x29b   :  { %2199 = vmatpush3.bf16.msra.mxu0 %v2298_v48 }
 0x29c   :  { %2200 = vmatprep.subr.bf16.mxu0 %v2383_v9 }
 0x29f   :  { %2201 = vmatpush3.bf16.msra.mxu0 %v2299_v41 }
 0x2a0   :  { %2202 = vmatprep.subr.bf16.mxu0 %v2383_v9 }
 0x2a3   :  { %2203 = vmatpush3.bf16.msra.mxu0 %v2300_v50 }
 0x2a4   :  { %2204 = vmatprep.subr.bf16.mxu0 %v2383_v9 }
 0x2a7   :  { %2205 = vmatpush3.bf16.msra.mxu0 %v2301_v2 }
 0x34a   :  { %v1619_v4 = vpop.f32.mrf.mxu0 }
 0x34b   :  { %v1626_v37 = vsel %vm1625_vm2, %v1619_v4, 0.0 }
 0x34c   :  { %v1627_v31 = vrot.slane %v1626_v37, 4  ;;  %v2168_v27 = vpop.f32.mrf.mxu0 }
 0x34e   :  { %v1628_v11 = vadd.f32 %v1627_v31, %v1626_v37  ;;  %v1622_v21 = vpop.f32.mrf.mxu0 }
 0x350   :  { %v1629_v33 = vrot.slane %v1628_v11, 2  ;;  %v2169_v35 = vpop.f32.mrf.mxu0 }
 0x351   :  { %v2103_v35 = vld [vmem:[%s4103_s9] ss:$0 sm:$0xff] }
 0x352   :  { %v1630_v56 = vadd.f32 %v1629_v33, %v1628_v11 }
 0x354   :  { %v1631_v16 = vrot.slane %v1630_v56, 1 }
 0x356   :  { %v1632_v61 = vadd.f32 %v1631_v16, %v1630_v56  ;;  %v2104_v16 = vld [vmem:[%s4104_s10] ss:$0 sm:$0xff] }
 0x358   :  { %v1634_v62 = vmul.f32 0.5, %v1632_v61 }
 0x35a   :  { %v1635_v63 = vsub.f32 %v1619_v4, %v1634_v62 }
 0x35c   :  { %v1636_v28 = vmul.f32 %v1635_v63, %v1635_v63 }
 0x35e   :  { %v1637_v60 = vsel %vm1625_vm2, %v1636_v28, 0.0 }
 0x35f   :  { %v1638_v25 = vrot.slane %v1637_v60, 4 }
 0x361   :  { %v1639_v57 = vadd.f32 %v1638_v25, %v1637_v60 }
 0x363   :  { %v1640_v17 = vrot.slane %v1639_v57, 2 }
 0x365   :  { %v1641_v20 = vadd.f32 %v1640_v17, %v1639_v57 }
 0x367   :  { %v1642_v58 = vrot.slane %v1641_v20, 1 }
 0x369   :  { %v1643_v1 = vadd.f32 %v1642_v58, %v1641_v20 }
 0x36b   :  { %v1644_v47 = vmul.f32 0.5, %v1643_v1 }
 0x36d   :  { %v1645_v14 = vadd.f32 1e-05, %v1644_v47 }
 0x36f   :  { %2310 = vrsqrt.f32 %v1645_v14 }
 0x37c   :  { %v2311_v15 = vpop.eup %2310 }
 0x37d   :  { %v1647_v5 = vmul.f32 %v2311_v15, %v1635_v63 }
 0x37f   :  { %v1655_v53 = vmul.f32 %v2084_v44, %v1647_v5 }
 0x381   :  { %v1663_v18 = vadd.f32 %v2085_v19, %v1655_v53 }
 0x383   :  { %v1664_v3 = vmax.f32 %v1663_v18, 0.0 }
 0x385   :  { %v1665_v45 = vpack.c.bf16 %v1664_v3, %v1664_v3 }
 0x387   :  { %2187 = vmatmul.mubr.bf16.vlgmr.msra.gmra.mxu1 %v1665_v45 }
 0x388   :  { %2226 = vmatprep.mubr.msk.bf16.mxu1 %vm2384_vm0, %v2383_v9  ;;  %2211 = vmatpush3.bf16.msra.mxu1 %v2302_v59 }
 0x389   :  { %2212 = vmatprep.subr.bf16.mxu1 %v2383_v9 }
 0x38c   :  { %2213 = vmatpush3.bf16.msra.mxu1 %v2303_v42 }
 0x38d   :  { %2214 = vmatprep.subr.bf16.mxu1 %v2383_v9 }
 0x390   :  { %2215 = vmatpush3.bf16.msra.mxu1 %v2304_v13 }
 0x391   :  { %2216 = vmatprep.subr.bf16.mxu1 %v2383_v9 }
 0x394   :  { %2217 = vmatpush3.bf16.msra.mxu1 %v2305_v22 }
 0x395   :  { %2218 = vmatprep.subr.bf16.mxu1 %v2383_v9 }
 0x398   :  { %2219 = vmatpush3.bf16.msra.mxu1 %v2306_v49 }
 0x399   :  { %2220 = vmatprep.subr.bf16.mxu1 %v2383_v9 }
 0x39c   :  { %2221 = vmatpush3.bf16.msra.mxu1 %v2307_v8 }
 0x39d   :  { %2222 = vmatprep.subr.bf16.mxu1 %v2383_v9 }
 0x3a0   :  { %2223 = vmatpush3.bf16.msra.mxu1 %v2308_v55 }
 0x3a1   :  { %2224 = vmatprep.subr.bf16.mxu1 %v2383_v9 }
 0x3a4   :  { %2225 = vmatpush3.bf16.msra.mxu1 %v2309_v23 }
 0x447   :  { %v1771_v10 = vpop.f32.mrf.mxu1 }
 0x448   :  { %v1772_v43 = vadd.f32 %v2086_v46, %v1771_v10 }
 0x449   :  { %v2188_v0 = vpop.f32.mrf.mxu1 }
 0x44a   :  { %v1778_v38 = vpack.c.bf16 %v1772_v43, %v1772_v43  ;;  %1777 = vst [vmem:[#allocation4] sm:$0x3] %v1772_v43 }
 0x44b   :  { %v1774_v7 = vpop.f32.mrf.mxu1 }
 0x44c   :  { %2207 = vmatmul.mubr.bf16.vlgmr.msra.gmra.mxu0 %v1778_v38 }
 0x44d   :  { %v2189_v52 = vpop.f32.mrf.mxu1 }
 0x50c   :  { %v1877_v12 = vpop.f32.mrf.mxu0 }
 0x50d   :  { %v1883_v54 = vsel %vm1625_vm2, %v1877_v12, 0.0 }
 0x50e   :  { %v1884_v36 = vrot.slane %v1883_v54, 4  ;;  %v2208_v6 = vpop.f32.mrf.mxu0 }
 0x510   :  { %v1885_v24 = vadd.f32 %v1884_v36, %v1883_v54  ;;  %v1880_v39 = vpop.f32.mrf.mxu0 }
 0x512   :  { %v1886_v30 = vrot.slane %v1885_v24, 2  ;;  %v2209_v29 = vpop.f32.mrf.mxu0 }
 0x514   :  { %v1887_v34 = vadd.f32 %v1886_v30, %v1885_v24 }
 0x516   :  { %v1888_v40 = vrot.slane %v1887_v34, 1 }
 0x518   :  { %v1889_v26 = vadd.f32 %v1888_v40, %v1887_v34 }
 0x51a   :  { %v1890_v48 = vmul.f32 0.5, %v1889_v26 }
 0x51c   :  { %v1891_v51 = vsub.f32 %v1877_v12, %v1890_v48 }
 0x51e   :  { %v1892_v41 = vmul.f32 %v1891_v51, %v1891_v51 }
 0x520   :  { %v1893_v32 = vsel %vm1625_vm2, %v1892_v41, 0.0 }
 0x521   :  { %v1894_v50 = vrot.slane %v1893_v32, 4 }
 0x523   :  { %v1895_v9 = vadd.f32 %v1894_v50, %v1893_v32 }
 0x525   :  { %v1896_v4 = vrot.slane %v1895_v9, 2 }
 0x527   :  { %v1897_v37 = vadd.f32 %v1896_v4, %v1895_v9 }
 0x529   :  { %v1898_v31 = vrot.slane %v1897_v37, 1 }
 0x52b   :  { %v1899_v27 = vadd.f32 %v1898_v31, %v1897_v37 }
 0x52d   :  { %v1900_v11 = vmul.f32 0.5, %v1899_v27 }
 0x52f   :  { %v1901_v21 = vadd.f32 1e-05, %v1900_v11 }
 0x531   :  { %2312 = vrsqrt.f32 %v1901_v21 }
 0x53e   :  { %v2313_v33 = vpop.eup %2312 }
 0x53f   :  { %v1903_v56 = vmul.f32 %v2313_v33, %v1891_v51 }
 0x541   :  { %v1911_v61 = vmul.f32 %v2103_v35, %v1903_v56 }
 0x543   :  { %v1919_v62 = vadd.f32 %v2104_v16, %v1911_v61 }
 0x545   :  { %v1920_v63 = vmax.f32 %v1919_v62, 0.0 }
 0x547   :  { %v1921_v28 = vpack.c.bf16 %v1920_v63, %v1920_v63 }
 0x549   :  { %2227 = vmatmul.mubr.bf16.vlgmr.msra.gmra.mxu1 %v1921_v28 }
 0x54a   :  { %2325 = shalt.err (!%p2322_p4)
}
 0x54b   :  { %2053 = dma.vmem_to_hbm [thread:$0]  %s2051_s18, 32, %s4108_s14, [#allocation5]  }
 0x54c   :  { %s2386_s10 = smov [#allocation2]  }
 0x54d   :  { %s2040_s4 = sshll.u32 %s2386_s10, 4  ;;  %s2041_s4 = int_to_ptr.vmem [resolvable:$true] %s2040_s4 }
 0x54e   :  { %s2334_s5 = scalar_lea.vmem %s2041_s4, 32  ;;  %p2339_p6 = scmp.lt.s32.totalorder %s2041_s4, %s2041_s4 }
 0x54f   :  { %p2335_p5 = scmp.ne.s32.totalorder %s2041_s4, %s2334_s5  ;;  %p2340_p7 = scmp.lt.s32.totalorder %s2334_s5, %s2334_s5 }
 0x551   :  { %p2341_p8 = por %p2340_p7, %p2339_p6 }
 0x553   :  { %p2342_p9 = pnand %p2341_p8, %p2335_p5 }
 0x555   :  { %2345 = shalt.err (!%p2342_p9)
}
 0x556   :  { %2043 = dma.vmem_to_hbm [thread:$0]  %s2041_s4, 32, %s4107_s13, [#allocation3]   ;;  %v2105_v60 = vld [vmem:[%s4106_s12] ss:$0 sm:$0xff] }
 0x557   :  { %s2387_s3 = smov [#allocation6]  }
 0x558   :  { %s2060_s14 = sshll.u32 %s2387_s3, 4  ;;  %s2061_s14 = int_to_ptr.vmem [resolvable:$true] %s2060_s14 }
 0x559   :  { %s2354_s22 = scalar_lea.vmem %s2061_s14, 32  ;;  %p2359_p11 = scmp.lt.s32.totalorder %s2061_s14, %s2061_s14 }
 0x55a   :  { %p2355_p10 = scmp.ne.s32.totalorder %s2061_s14, %s2354_s22  ;;  %p2360_p12 = scmp.lt.s32.totalorder %s2354_s22, %s2354_s22 }
 0x55c   :  { %p2361_p13 = por %p2360_p12, %p2359_p11 }
 0x55e   :  { %p2362_p0 = pnand %p2361_p13, %p2355_p10 }
 0x609   :  { %v2027_v25 = vpop.f32.mrf.mxu1 }
 0x60a   :  { %v2028_v57 = vadd.f32 %v2105_v60, %v2027_v25 }
 0x60b   :  { %v2228_v17 = vpop.f32.mrf.mxu1 }
 0x60c   :  { %2033 = vst [vmem:[#allocation6] sm:$0x3] %v2028_v57 }
 0x60d   :  { %v2030_v20 = vpop.f32.mrf.mxu1 }
 0x60e   :  { %2365 = shalt.err (!%p2362_p0)
}
 0x60f   :  { %2063 = dma.vmem_to_hbm [thread:$0]  %s2061_s14, 32, %s4109_s15, [#allocation5]   ;;  %v2229_v58 = vpop.f32.mrf.mxu1 }
 0x610   :  { %2374 = dma.done.wait [#allocation3], 32  }
 0x611   :  { %2375 = vsyncadd [#allocation3], 4294967264 }
 0x612   :  { %2376 = dma.done.wait [#allocation5], 64  }
 0x613   :  { %2377 = vsyncadd [#allocation5], 4294967232 }
 0x614   :  { %2073 = vsyncpa [#allocation3], 1 }
 0x615   :  { %2074 = vsyncpa [#allocation5], 1 }

</bundles_post_ra>
